<compile_context>
chip_gen: v6e
topology: v6e:2x2x1
jax: 0.10.0
libtpu: 0.0.40
codegen_flags: <defaults>
</compile_context>

<pallas_src>
import functools

import jax
import jax.numpy as jnp
from jax.experimental import pallas as pl
from jax.experimental.pallas import tpu as pltpu

# Problem geometry (Metric spec: batches of shape (*, C, H, W); here nbatch_dims == 1).
H = W = 16
C_IN = 4
C_OUT = 32
N_CLASSES = 10
KH = KW = 3
HP, WP = H + 2, W + 2              # zero-padded spatial dims (padding=1)
LANES_IN = WP * C_IN               # 72  : packed (w, cin) lane axis of the padded input
LANES_CONV = W * C_OUT             # 512 : packed (w, cout) lane axis of the conv output


def metric_fwd_kernel(x_ref, band_ref, bc_ref, pool_ref, wl_ref, bl_ref, o_ref):
    """Metric forward for one block of NB samples.

    x_ref:    (NB, HP, WP*C_IN)       bf16  zero-padded NHWC input, (w, cin) on lanes
    band_ref: (KH, WP*C_IN, W*C_OUT)  f32   banded conv weights (one band per kh shift)
    bc_ref:   (1, W*C_OUT)            f32   conv bias tiled over the 16 w lane groups
    pool_ref: (W*C_OUT, C_OUT)        f32   lane-group averaging matrix (tiled I / (H*W))
    wl_ref:   (C_OUT, N_CLASSES)      f32   linear head weight
    bl_ref:   (1, N_CLASSES)          f32   linear head bias
    o_ref:    (1, 1, NB)              f32   per-sample max softmax prob (lane-dense)
    """
    nb = x_ref.shape[0]
    rows = nb * H

    # HBM traffic is bf16; everything after the load is f32 (v5e-friendly elementwise).
    x = x_ref[...].astype(jnp.float32)                       # (NB, HP, 72)

    # Conv2d(3x3, padding=1): 3 row-shifted banded matmuls accumulated in f32.
    # Each band already folds the (kw, cin) contraction and the w output position.
    acc = None
    for kh in range(KH):                                     # static, unrolled
        xk = x[:, kh:kh + H, :].reshape(rows, LANES_IN)      # (NB*H, 72)
        part = jnp.dot(xk, band_ref[kh], preferred_element_type=jnp.float32)
        acc = part if acc is None else acc + part            # (NB*H, 512)
    hidden = jnp.maximum(acc + bc_ref[...], 0.0)             # bias + ReLU (VPU, f32)

    # Global average pool: sum the 16 (w, cout) lane groups with a tiny constant matmul,
    # then sum the H rows of each sample with an XLU cross-sublane reduce.
    hsum = jnp.dot(hidden, pool_ref[...],
                   preferred_element_type=jnp.float32)       # (NB*H, C_OUT)
    pooled = jnp.sum(hsum.reshape(nb, H, C_OUT), axis=1)     # (NB, C_OUT)

    # Linear head + metric: max softmax prob = 1 / sum_k exp(l_k - max_k l).
    logits = jnp.dot(pooled, wl_ref[...],
                     preferred_element_type=jnp.float32) + bl_ref[...]   # (NB, K)
    m = jnp.max(logits, axis=-1, keepdims=True)              # (NB, 1)
    e = jnp.exp(logits - m)                                  # (NB, K)
    # Contract the class axis against a ones row so the result lands lane-dense (1, NB).
    z = jnp.einsum('ok,nk->on', jnp.ones((1, N_CLASSES), jnp.float32), e,
                   preferred_element_type=jnp.float32)       # (1, NB)
    o_ref[...] = pl.reciprocal(z, approx=True).reshape(1, 1, nb)


def metric_forward(x_nchw, w_conv_oihw, b_conv, w_lin, b_lin, *, block_samples=8):
    """Metric.forward: x is (N, C, H, W) float32 (PyTorch layout); returns (N,)."""
    n = x_nchw.shape[0]
    nb = min(block_samples, n)
    n_pad = pl.cdiv(n, nb) * nb
    num_blocks = n_pad // nb

    # ---- layout plumbing (cheap XLA ops; no data amplification) ----
    # NCHW -> NHWC -> zero-pad -> pack (w, cin) onto the lane axis -> bf16 for DMA.
    x_nhwc = jnp.transpose(x_nchw, (0, 2, 3, 1))
    xp = jnp.pad(x_nhwc, ((0, n_pad - n), (1, 1), (1, 1), (0, 0)))
    x3 = xp.reshape(n_pad, HP, LANES_IN).astype(jnp.bfloat16)

    # Banded conv weights: band[kh, wp*C_IN+cin, w*C_OUT+cout] = W[cout, cin, kh, wp-w]
    # for 0 <= wp - w < KW, else 0.  Small constant: (3, 72, 512) f32.
    wk = jnp.transpose(w_conv_oihw, (2, 3, 1, 0)).astype(jnp.float32)   # (KH,KW,C_IN,C_OUT)
    sel = (jnp.arange(WP)[None, :, None]
           == jnp.arange(W)[None, None, :]
           + jnp.arange(KW)[:, None, None]).astype(jnp.float32)         # (KW, WP, W)
    band = jnp.einsum('kpw,hkcd->hpcwd', sel, wk).reshape(KH, LANES_IN, LANES_CONV)

    bias_c = jnp.tile(b_conv.astype(jnp.float32), W).reshape(1, LANES_CONV)
    pool = jnp.tile(jnp.eye(C_OUT, dtype=jnp.float32), (W, 1)) / float(H * W)  # (512, 32)

    out = pl.pallas_call(
        metric_fwd_kernel,
        out_shape=jax.ShapeDtypeStruct((num_blocks, 1, nb), jnp.float32),
        grid=(num_blocks,),
        in_specs=[
            pl.BlockSpec((nb, HP, LANES_IN), lambda i: (i, 0, 0)),        # streamed input
            pl.BlockSpec((KH, LANES_IN, LANES_CONV), lambda i: (0, 0, 0)),  # resident weights
            pl.BlockSpec((1, LANES_CONV), lambda i: (0, 0)),
            pl.BlockSpec((LANES_CONV, C_OUT), lambda i: (0, 0)),
            pl.BlockSpec((C_OUT, N_CLASSES), lambda i: (0, 0)),
            pl.BlockSpec((1, N_CLASSES), lambda i: (0, 0)),
        ],
        out_specs=pl.BlockSpec((1, 1, nb), lambda i: (i, 0, 0)),          # lane-dense
        compiler_params=pltpu.CompilerParams(
            dimension_semantics=("parallel",),        # megacore / v7x second TC
            vmem_limit_bytes=32 * 1024 * 1024),
    )(x3, band, bias_c, pool,
      w_lin.astype(jnp.float32), b_lin.reshape(1, N_CLASSES).astype(jnp.float32))

    return out.reshape(n_pad)[:n]                                         # (N,)


def reference_forward(x_nchw, w_conv_oihw, b_conv, w_lin, b_lin):
    """Pure-JAX f32 reference of the same metric (for correctness checking)."""
    conv = jax.lax.conv_general_dilated(
        x_nchw, w_conv_oihw, window_strides=(1, 1), padding='SAME',
        dimension_numbers=('NCHW', 'OIHW', 'NCHW'))
    conv = conv + b_conv.reshape(1, -1, 1, 1)
    h = jnp.maximum(conv, 0.0)
    pooled = jnp.mean(h, axis=(2, 3))
    logits = pooled @ w_lin + b_lin
    p = jax.nn.softmax(logits, axis=-1)
    return jnp.max(p, axis=-1)


# TODO(synk): the base class' mc_integrate path (nbatch_dims > 1) and
# __getstate__/device-placement plumbing have no kernel-level equivalent;
# for data_shape == (N, C, H, W) that path is unreachable anyway.

if __name__ == "__main__":
    key = jax.random.PRNGKey(0)
    kx, kw1, kb1, kw2, kb2 = jax.random.split(key, 5)
    N = 16                                       # 2 grid steps at block_samples=8
    x = jax.random.normal(kx, (N, C_IN, H, W), dtype=jnp.float32)
    w_conv = jax.random.normal(kw1, (C_OUT, C_IN, KH, KW), dtype=jnp.float32) * 0.1
    b_conv = jax.random.normal(kb1, (C_OUT,), dtype=jnp.float32) * 0.1
    w_lin = jax.random.normal(kw2, (C_OUT, N_CLASSES), dtype=jnp.float32) * 0.1
    b_lin = jax.random.normal(kb2, (N_CLASSES,), dtype=jnp.float32) * 0.1

    fwd = jax.jit(functools.partial(metric_forward, block_samples=8))
    out = jax.block_until_ready(fwd(x, w_conv, b_conv, w_lin, b_lin))

    ref = reference_forward(x, w_conv, b_conv, w_lin, b_lin)
    assert out.shape == (N,), out.shape
    # bf16 input streaming + approx reciprocal => slightly loosened tolerance (per review).
    assert jnp.allclose(out, ref, rtol=2e-2, atol=2e-3), (out, ref)
    print("KERNEL_OK")
</pallas_src>

<mosaic_0001>
module attributes {stable_mosaic.version = 11 : i64} {
  func.func @metric_fwd_kernel(%arg0: i32, %arg1: memref<8x18x72xbf16, #tpu.memory_space<vmem>>, %arg2: memref<3x72x512xf32, #tpu.memory_space<vmem>>, %arg3: memref<1x512xf32, #tpu.memory_space<vmem>>, %arg4: memref<512x32xf32, #tpu.memory_space<vmem>>, %arg5: memref<32x10xf32, #tpu.memory_space<vmem>>, %arg6: memref<1x10xf32, #tpu.memory_space<vmem>>, %arg7: memref<1x1x8xf32, #tpu.memory_space<vmem>>) attributes {dimension_semantics = [#tpu.dimension_semantics<parallel>], iteration_bounds = array<i64: 2>, scalar_prefetch = 0 : i64, scratch_operands = 0 : i64, tpu.core_type = #tpu.core_type<tc>, window_params = [{transform_indices = @transform_0, window_bounds = array<i64: 8, 18, 72>}, {pipeline_mode = #tpu.pipeline_mode<synchronous>, transform_indices = @transform_1, window_bounds = array<i64: 3, 72, 512>}, {pipeline_mode = #tpu.pipeline_mode<synchronous>, transform_indices = @transform_2, window_bounds = array<i64: 1, 512>}, {pipeline_mode = #tpu.pipeline_mode<synchronous>, transform_indices = @transform_3, window_bounds = array<i64: 512, 32>}, {pipeline_mode = #tpu.pipeline_mode<synchronous>, transform_indices = @transform_4, window_bounds = array<i64: 32, 10>}, {pipeline_mode = #tpu.pipeline_mode<synchronous>, transform_indices = @transform_5, window_bounds = array<i64: 1, 10>}, {transform_indices = @transform_6, window_bounds = array<i64: 1, 1, 8>}]} {
    %c0 = arith.constant 0 : index
    %c0_0 = arith.constant 0 : index
    %c0_1 = arith.constant 0 : index
    %0 = vector.load %arg1[%c0, %c0_0, %c0_1] : memref<8x18x72xbf16, #tpu.memory_space<vmem>>, vector<8x18x72xbf16>
    %1 = arith.extf %0 : vector<8x18x72xbf16> to vector<8x18x72xf32>
    %2 = vector.extract_strided_slice %1 {offsets = [0, 0, 0], sizes = [8, 16, 72], strides = [1, 1, 1]} : vector<8x18x72xf32> to vector<8x16x72xf32>
    %3 = vector.shape_cast %2 : vector<8x16x72xf32> to vector<128x72xf32>
    %c0_2 = arith.constant 0 : index
    %c0_3 = arith.constant 0 : index
    %c0_4 = arith.constant 0 : index
    %4 = vector.load %arg2[%c0_2, %c0_3, %c0_4] : memref<3x72x512xf32, #tpu.memory_space<vmem>>, vector<1x72x512xf32>
    %5 = vector.shape_cast %4 : vector<1x72x512xf32> to vector<72x512xf32>
    %cst = arith.constant dense<0.000000e+00> : vector<128x512xf32>
    %6 = tpu.matmul %3, %5, %cst {dimension_numbers = #tpu.dot_dimension_numbers<[1], [0], [0], [1], [0, 0, 1, 1], [], []>} : vector<128x72xf32>, vector<72x512xf32>, vector<128x512xf32> -> vector<128x512xf32>
    %7 = vector.extract_strided_slice %1 {offsets = [0, 1, 0], sizes = [8, 16, 72], strides = [1, 1, 1]} : vector<8x18x72xf32> to vector<8x16x72xf32>
    %8 = vector.shape_cast %7 : vector<8x16x72xf32> to vector<128x72xf32>
    %c1 = arith.constant 1 : index
    %c0_5 = arith.constant 0 : index
    %c0_6 = arith.constant 0 : index
    %9 = vector.load %arg2[%c1, %c0_5, %c0_6] : memref<3x72x512xf32, #tpu.memory_space<vmem>>, vector<1x72x512xf32>
    %10 = vector.shape_cast %9 : vector<1x72x512xf32> to vector<72x512xf32>
    %cst_7 = arith.constant dense<0.000000e+00> : vector<128x512xf32>
    %11 = tpu.matmul %8, %10, %cst_7 {dimension_numbers = #tpu.dot_dimension_numbers<[1], [0], [0], [1], [0, 0, 1, 1], [], []>} : vector<128x72xf32>, vector<72x512xf32>, vector<128x512xf32> -> vector<128x512xf32>
    %12 = arith.addf %6, %11 : vector<128x512xf32>
    %13 = vector.extract_strided_slice %1 {offsets = [0, 2, 0], sizes = [8, 16, 72], strides = [1, 1, 1]} : vector<8x18x72xf32> to vector<8x16x72xf32>
    %14 = vector.shape_cast %13 : vector<8x16x72xf32> to vector<128x72xf32>
    %c2 = arith.constant 2 : index
    %c0_8 = arith.constant 0 : index
    %c0_9 = arith.constant 0 : index
    %15 = vector.load %arg2[%c2, %c0_8, %c0_9] : memref<3x72x512xf32, #tpu.memory_space<vmem>>, vector<1x72x512xf32>
    %16 = vector.shape_cast %15 : vector<1x72x512xf32> to vector<72x512xf32>
    %cst_10 = arith.constant dense<0.000000e+00> : vector<128x512xf32>
    %17 = tpu.matmul %14, %16, %cst_10 {dimension_numbers = #tpu.dot_dimension_numbers<[1], [0], [0], [1], [0, 0, 1, 1], [], []>} : vector<128x72xf32>, vector<72x512xf32>, vector<128x512xf32> -> vector<128x512xf32>
    %18 = arith.addf %12, %17 : vector<128x512xf32>
    %c0_11 = arith.constant 0 : index
    %c0_12 = arith.constant 0 : index
    %19 = vector.load %arg3[%c0_11, %c0_12] : memref<1x512xf32, #tpu.memory_space<vmem>>, vector<1x512xf32>
    %20 = vector.broadcast %19 : vector<1x512xf32> to vector<128x512xf32>
    %21 = arith.addf %18, %20 : vector<128x512xf32>
    %cst_13 = arith.constant 0.000000e+00 : f32
    %22 = vector.broadcast %cst_13 : f32 to vector<128x512xf32>
    %23 = arith.maximumf %21, %22 : vector<128x512xf32>
    %c0_14 = arith.constant 0 : index
    %c0_15 = arith.constant 0 : index
    %24 = vector.load %arg4[%c0_14, %c0_15] : memref<512x32xf32, #tpu.memory_space<vmem>>, vector<512x32xf32>
    %cst_16 = arith.constant dense<0.000000e+00> : vector<128x32xf32>
    %25 = tpu.matmul %23, %24, %cst_16 {dimension_numbers = #tpu.dot_dimension_numbers<[1], [0], [0], [1], [0, 0, 1, 1], [], []>} : vector<128x512xf32>, vector<512x32xf32>, vector<128x32xf32> -> vector<128x32xf32>
    %26 = vector.shape_cast %25 : vector<128x32xf32> to vector<8x16x32xf32>
    %cst_17 = arith.constant dense<0.000000e+00> : vector<8x32xf32>
    %27 = vector.multi_reduction <add>, %26, %cst_17 [1] : vector<8x16x32xf32> to vector<8x32xf32>
    %c0_18 = arith.constant 0 : index
    %c0_19 = arith.constant 0 : index
    %28 = vector.load %arg5[%c0_18, %c0_19] : memref<32x10xf32, #tpu.memory_space<vmem>>, vector<32x10xf32>
    %cst_20 = arith.constant dense<0.000000e+00> : vector<8x10xf32>
    %29 = tpu.matmul %27, %28, %cst_20 {dimension_numbers = #tpu.dot_dimension_numbers<[1], [0], [0], [1], [0, 0, 1, 1], [], []>} : vector<8x32xf32>, vector<32x10xf32>, vector<8x10xf32> -> vector<8x10xf32>
    %c0_21 = arith.constant 0 : index
    %c0_22 = arith.constant 0 : index
    %30 = vector.load %arg6[%c0_21, %c0_22] : memref<1x10xf32, #tpu.memory_space<vmem>>, vector<1x10xf32>
    %31 = vector.broadcast %30 : vector<1x10xf32> to vector<8x10xf32>
    %32 = arith.addf %29, %31 : vector<8x10xf32>
    %cst_23 = arith.constant dense<0xFF800000> : vector<8xf32>
    %33 = vector.multi_reduction <maximumf>, %32, %cst_23 [1] : vector<8x10xf32> to vector<8xf32>
    %34 = vector.shape_cast %33 : vector<8xf32> to vector<8x1xf32>
    %35 = vector.broadcast %34 : vector<8x1xf32> to vector<8x10xf32>
    %36 = arith.subf %32, %35 : vector<8x10xf32>
    %37 = math.exp %36 : vector<8x10xf32>
    %cst_24 = arith.constant 1.000000e+00 : f32
    %38 = vector.broadcast %cst_24 : f32 to vector<1x10xf32>
    "tpu.trace_start"() <{level = 10 : i32, message = "ok,nk->on"}> : () -> ()
    %cst_25 = arith.constant dense<0.000000e+00> : vector<1x8xf32>
    %39 = tpu.matmul %38, %37, %cst_25 {dimension_numbers = #tpu.dot_dimension_numbers<[1], [1], [0], [0], [0, 0, 1, 0], [], []>} : vector<1x10xf32>, vector<8x10xf32>, vector<1x8xf32> -> vector<1x8xf32>
    "tpu.trace_stop"() : () -> ()
    %40 = tpu.reciprocal %39 {approx = true} : vector<1x8xf32> -> vector<1x8xf32>
    %41 = vector.shape_cast %40 : vector<1x8xf32> to vector<1x1x8xf32>
    %c0_26 = arith.constant 0 : index
    %c0_27 = arith.constant 0 : index
    %c0_28 = arith.constant 0 : index
    %42 = vector.load %arg7[%c0_26, %c0_27, %c0_28] : memref<1x1x8xf32, #tpu.memory_space<vmem>>, vector<1x1x8xf32>
    tpu.vector_store %arg7[%c0_26, %c0_27, %c0_28], %41 {strides = array<i32>} : memref<1x1x8xf32, #tpu.memory_space<vmem>>, vector<1x1x8xf32>,
    return
  }
  func.func @transform_0(%arg0: i32) -> (i32, i32, i32) {
    %c0_i32 = arith.constant 0 : i32
    %c0_i32_0 = arith.constant 0 : i32
    %c0_i32_1 = arith.constant 0 : i32
    return %arg0, %c0_i32, %c0_i32_0 : i32, i32, i32
  }
  func.func @transform_1(%arg0: i32) -> (i32, i32, i32) {
    %c0_i32 = arith.constant 0 : i32
    %c0_i32_0 = arith.constant 0 : i32
    %c0_i32_1 = arith.constant 0 : i32
    %c0_i32_2 = arith.constant 0 : i32
    return %c0_i32, %c0_i32_0, %c0_i32_1 : i32, i32, i32
  }
  func.func @transform_2(%arg0: i32) -> (i32, i32) {
    %c0_i32 = arith.constant 0 : i32
    %c0_i32_0 = arith.constant 0 : i32
    %c0_i32_1 = arith.constant 0 : i32
    return %c0_i32, %c0_i32_0 : i32, i32
  }
  func.func @transform_3(%arg0: i32) -> (i32, i32) {
    %c0_i32 = arith.constant 0 : i32
    %c0_i32_0 = arith.constant 0 : i32
    %c0_i32_1 = arith.constant 0 : i32
    return %c0_i32, %c0_i32_0 : i32, i32
  }
  func.func @transform_4(%arg0: i32) -> (i32, i32) {
    %c0_i32 = arith.constant 0 : i32
    %c0_i32_0 = arith.constant 0 : i32
    %c0_i32_1 = arith.constant 0 : i32
    return %c0_i32, %c0_i32_0 : i32, i32
  }
  func.func @transform_5(%arg0: i32) -> (i32, i32) {
    %c0_i32 = arith.constant 0 : i32
    %c0_i32_0 = arith.constant 0 : i32
    %c0_i32_1 = arith.constant 0 : i32
    return %c0_i32, %c0_i32_0 : i32, i32
  }
  func.func @transform_6(%arg0: i32) -> (i32, i32, i32) {
    %c0_i32 = arith.constant 0 : i32
    %c0_i32_0 = arith.constant 0 : i32
    %c0_i32_1 = arith.constant 0 : i32
    return %arg0, %c0_i32, %c0_i32_0 : i32, i32, i32
  }
}

</mosaic_0001>

<bundles_post_ra>
// kernel: tile.13
= control target key start
LH: loop header
LB: loop body
LE: loop exit
PB: predicated region body
PF: predicated region fallthrough
CT: control target
= control target key end

     0   :  { %s28_s0 = inlined_call_operand.vmem [shape: f32[32], index: 0, kind: input, shape index: {}]   ;;  %s29_s1 = inlined_call_operand.vmem [shape: f32[16,32], index: 1, kind: output, shape index: {}]  }
   0x1   :  { %v4_v0 = vld [vmem:[%s28_s0] ss:$0 sm:$0xff] }
   0x2   :  { %5 = vst [vmem:[%s29_s1] sm:$0xff] %v4_v0  ;;  %8 = vst [vmem:[%s29_s1 + $0x8] sm:$0xff] %v4_v0 }

// kernel: tile.14
= control target key start
LH: loop header
LB: loop body
LE: loop exit
PB: predicated region body
PF: predicated region fallthrough
CT: control target
= control target key end

     0   :  { %s62_s8 = smov 96   ;;  %vm3_vm0 = vcmask 261120   ;;  %s64_s15 = smov 64   ;;  %vm9_vm1 = vcmask 1048320   ;;  %vm15_vm2 = vcmask 785920   ;;  %vm21_vm3 = vcmask 523520   ;;  %s99_s0 = inlined_call_operand.vmem [shape: f32[16,32], index: 0, kind: input, shape index: {}]   ;;  %s100_s1 = inlined_call_operand.vmem [shape: f32[1,512], index: 1, kind: output, shape index: {}]  }
   0x1   :  { %v53_v0 = vld [vmem:[%s99_s0 + $0x3] ss:$4 sm:$0xf]   ;;  %v54_v1 = vld [vmem:[%s99_s0 + $0x2] ss:$4 sm:$0xf]  }
   0x2   :  { %7 = vrot.lane.b32.xlu0 %v53_v0, %s62_s8  ;;  %v55_v2 = vld [vmem:[%s99_s0 + $0x1] ss:$4 sm:$0xf]   ;;  %v2_v3 = vld [vmem:[%s99_s0] ss:$4 sm:$0xf]  }
   0x3   :  { %s63_s0 = smov 32   ;;  %4 = vst.msk [vmem:[#allocation0] ss:$8 sm:$0xf] %vm3_vm0, %v2_v3  }
   0x4   :  { %19 = vrot.lane.b32.xlu1 %v55_v2, %s63_s0 }
   0x6   :  { %13 = vrot.lane.b32.xlu0 %v54_v1, %s64_s15 }
  0x74   :  { %v8_v4 = vpop.permute.xlu0 %7  }
  0x75   :  { %10 = vst.msk [vmem:[#allocation0] ss:$8 sm:$0xf] %vm9_vm1, %v8_v4  }
  0x76   :  { %v20_v5 = vpop.permute.xlu1 %19  }
  0x78   :  { %v14_v6 = vpop.permute.xlu0 %13  }
  0x79   :  { %16 = vst.msk [vmem:[#allocation0] ss:$8 sm:$0xf] %vm15_vm2, %v14_v6  }
  0x7a   :  { %22 = vst.msk [vmem:[#allocation0] ss:$8 sm:$0xf] %vm21_vm3, %v20_v5  }
  0x81   :  { %v27_v7 = vld [vmem:[#allocation0] sm:$0x1]  ;;  %v32_v8 = vld [vmem:[#allocation0 + $0x8] sm:$0x1]  ;;  %v38_v9 = vld [vmem:[#allocation0 + $0x10] sm:$0x1] }
  0x82   :  { %30 = vst [vmem:[%s100_s1] sm:$0x1] %v27_v7  ;;  %56 = vst [vmem:[%s100_s1 + $0x1] sm:$0x1] %v32_v8  ;;  %v45_v10 = vld [vmem:[#allocation0 + $0x18] sm:$0x1] }
  0x83   :  { %57 = vst [vmem:[%s100_s1 + $0x2] sm:$0x1] %v38_v9  ;;  %58 = vst [vmem:[%s100_s1 + $0x3] sm:$0x1] %v45_v10 }

// kernel: metric_forward.1
= control target key start
LH: loop header
LB: loop body
LE: loop exit
PB: predicated region body
PF: predicated region fallthrough
CT: control target
= control target key end

     0   :  { %s2904_s21 = smov 0   ;;  %s4334_s0 = inlined_call_operand.vmem [shape: bf16[16,18,72], index: 0, kind: input, shape index: {}]   ;;  %s4335_s1 = inlined_call_operand.vmem [shape: f32[3,72,512], index: 1, kind: input, shape index: {}]   ;;  %s4336_s2 = inlined_call_operand.vmem [shape: f32[1,512], index: 2, kind: input, shape index: {}]   ;;  %s4337_s3 = inlined_call_operand.vmem [shape: f32[512,32], index: 3, kind: input, shape index: {}]   ;;  %s4338_s4 = inlined_call_operand.vmem [shape: f32[32,10], index: 4, kind: input, shape index: {}]   ;;  %s4339_s5 = inlined_call_operand.vmem [shape: f32[1,10], index: 5, kind: input, shape index: {}]   ;;  %s4340_s6 = inlined_call_operand.vmem [shape: f32[2,1,8], index: 6, kind: output, shape index: {}]  }
   0x1 LB: > { %s2910_s22 = sadd.s32 4294967295, %s2864_s21   ;;  %p2463_p0 = scmp.ge.s32.totalorder %s2864_s21, 1  ;;  %s2864_s21 = sphi %s2904_s21, %s16_s21  }
   0x2   : > { %p214_p1 = scmp.lt.s32.totalorder %s2864_s21, 3 }
   0x4   : > { %p215_p2 = pnand %p2463_p0, %p214_p1 }
   0x6   : > { %218 = sbr.rel (%p215_p2) target bundleno = 1200 (0x4b0), region = 44 }
   0xb   : > { %v2499_v0 = vld [vmem:[%s4335_s1 + $0x228] sm:$0xff]  ;;  %v2501_v1 = vld [vmem:[%s4335_s1 + $0x238] sm:$0xff]  ;;  %v2498_v2 = vld [vmem:[%s4335_s1 + $0x220] sm:$0xff]  ;;  %s2464_s29 = sshll.u32 %s2910_s22, 3  ;;  %vm361_vm0 = vcmask 1046528   ;;  %vm439_vm1 = vcmask 588800  }
   0xc   : > { %486 = vmatprep.subr.mxu0 %v2499_v0  ;;  %647 = vmatprep.subr.mxu1 %v2501_v1  ;;  %v2500_v3 = vld [vmem:[%s4335_s1 + $0x230] sm:$0xff]  ;;  %v2495_v4 = vld [vmem:[%s4335_s1 + $0x208] sm:$0xff]  ;;  %v2497_v5 = vld [vmem:[%s4335_s1 + $0x218] sm:$0xff]  ;;  %p244_p3 = scmp.lt.s32.totalorder %s2464_s29, 15  ;;  %v4341_v48 = vmov 0.0   ;;  %vm1148_vm2 = vcmask 1045504  }
   0xd   : > { %487 = vmatpush1.msra.mxu0 %v2498_v2  ;;  %648 = vmatpush1.msra.mxu1 %v2500_v3  ;;  %v2494_v6 = vld [vmem:[%s4335_s1 + $0x200] sm:$0xff]  ;;  %v2496_v7 = vld [vmem:[%s4335_s1 + $0x210] sm:$0xff]  ;;  %v2491_v8 = vld [vmem:[%s4335_s1 + $0x1e8] sm:$0xff]  ;;  %vm2867_vm3 = vmmov 0   ;;  %vm2148_vm4 = vcmask 261120   ;;  %vm2240_vm5 = vcmask 1041409  }
   0xe   : > { %488 = vmatprep.subr.mxu0 %v2495_v4  ;;  %649 = vmatprep.subr.mxu1 %v2497_v5  ;;  %v2493_v9 = vld [vmem:[%s4335_s1 + $0x1f8] sm:$0xff]  ;;  %v2490_v10 = vld [vmem:[%s4335_s1 + $0x1e0] sm:$0xff]  ;;  %v2492_v11 = vld [vmem:[%s4335_s1 + $0x1f0] sm:$0xff]  ;;  %s4445_s29 = smov (!%p244_p3, %s2464_s29), 15  ;;  %vm2242_vm6 = vcmask 1042434   ;;  %vm2244_vm7 = vcmask 1043459  }
   0xf   : > { %489 = vmatpush1.msra.mxu0 %v2494_v6  ;;  %650 = vmatpush1.msra.mxu1 %v2496_v7  ;;  %v2487_v12 = vld [vmem:[%s4335_s1 + $0x1c8] sm:$0xff]  ;;  %v2489_v13 = vld [vmem:[%s4335_s1 + $0x1d8] sm:$0xff]  ;;  %v2486_v14 = vld [vmem:[%s4335_s1 + $0x1c0] sm:$0xff]  ;;  %s2842_s11 = smul.u32 12, %s4445_s29  ;;  %vm2246_vm8 = vcmask 1044484   ;;  %vm2248_vm9 = vcmask 1045509  }
  0x10   : > { %490 = vmatprep.subr.mxu0 %v2491_v8  ;;  %651 = vmatprep.subr.mxu1 %v2493_v9  ;;  %v2488_v15 = vld [vmem:[%s4335_s1 + $0x1d0] sm:$0xff]  ;;  %v2483_v16 = vld [vmem:[%s4335_s1 + $0x1a8] sm:$0xff]  ;;  %v2485_v17 = vld [vmem:[%s4335_s1 + $0x1b8] sm:$0xff]  ;;  %vm2250_vm10 = vcmask 1046534   ;;  %vm2252_vm11 = vcmask 1047559   ;;  %vm2326_vm12 = vcmask 80896  }
  0x11   : > { %491 = vmatpush1.msra.mxu0 %v2490_v10  ;;  %652 = vmatpush1.msra.mxu1 %v2492_v11  ;;  %v2482_v18 = vld [vmem:[%s4335_s1 + $0x1a0] sm:$0xff]  ;;  %v2484_v19 = vld [vmem:[%s4335_s1 + $0x1b0] sm:$0xff]  ;;  %v2479_v20 = vld [vmem:[%s4335_s1 + $0x188] sm:$0xff]  ;;  %s2990_s8 = scalar_lea.vmem %s4334_s0, %s2842_s11  ;;  %p250_p4 = scmp.lt.s32.totalorder %s2910_s22, 1  ;;  %vm2410_vm13 = vcmask 57344  }
  0x12   : > { %492 = vmatprep.subr.mxu0 %v2487_v12  ;;  %653 = vmatprep.subr.mxu1 %v2489_v13  ;;  %v2481_v21 = vld [vmem:[%s4335_s1 + $0x198] sm:$0xff]  ;;  %v2478_v22 = vld [vmem:[%s4335_s1 + $0x180] sm:$0xff]  ;;  %v2480_v23 = vld [vmem:[%s4335_s1 + $0x190] sm:$0xff] }
  0x13   : > { %493 = vmatpush1.msra.mxu0 %v2486_v14  ;;  %654 = vmatpush1.msra.mxu1 %v2488_v15  ;;  %v2475_v24 = vld [vmem:[%s4335_s1 + $0x168] sm:$0xff]  ;;  %v2477_v25 = vld [vmem:[%s4335_s1 + $0x178] sm:$0xff]  ;;  %v2474_v26 = vld [vmem:[%s4335_s1 + $0x160] sm:$0xff]  ;;  %s4447_s22 = smov (!%p250_p4, %s2910_s22), 1 }
  0x14   : > { %494 = vmatprep.subr.mxu0 %v2483_v16  ;;  %655 = vmatprep.subr.mxu1 %v2485_v17  ;;  %v2476_v27 = vld [vmem:[%s4335_s1 + $0x170] sm:$0xff]  ;;  %v2471_v28 = vld [vmem:[%s4335_s1 + $0x148] sm:$0xff]  ;;  %v2473_v29 = vld [vmem:[%s4335_s1 + $0x158] sm:$0xff]  ;;  %s252_s11 = scalar_lea.vmem %s4340_s6, %s4447_s22 }
  0x15   : > { %495 = vmatpush1.msra.mxu0 %v2482_v18  ;;  %656 = vmatpush1.msra.mxu1 %v2484_v19  ;;  %v2641_v30 = vld [vmem:[%s2990_s8] sm:$0xff]   ;;  %v3012_v31 = vld [vmem:[%s2990_s8 + $0x8] sm:$0x1]  ;;  %v2472_v33 = vld [vmem:[%s4335_s1 + $0x150] sm:$0xff] }
  0x16   : > { %496 = vmatprep.subr.mxu0 %v2479_v20  ;;  %657 = vmatprep.subr.mxu1 %v2481_v21  ;;  %v2470_v32 = vld [vmem:[%s4335_s1 + $0x140] sm:$0xff]  ;;  %v3020_v34 = vunpack.c.l.bf16 %v2641_v30  ;;  %v3022_v35 = vunpack.c.h.bf16 %v2641_v30  ;;  %v279_v36 = vunpack.c.l.bf16 %v3012_v31  ;;  %v2467_v37 = vld [vmem:[%s4335_s1 + $0x128] sm:$0xff]  ;;  %v2469_v38 = vld [vmem:[%s4335_s1 + $0x138] sm:$0xff] }
  0x17   : > { %497 = vmatpush1.msra.mxu0 %v2478_v22  ;;  %658 = vmatpush1.msra.mxu1 %v2480_v23  ;;  %v256_v39 = vld [vmem:[%s2990_s8 + $0xc] sm:$0xff]   ;;  %v2466_v40 = vld [vmem:[%s4335_s1 + $0x120] sm:$0xff]  ;;  %v3049_v49 = vld [vmem:[%s2990_s8 + $0x14] sm:$0x1] }
  0x18   : > { %498 = vmatprep.subr.mxu0 %v2475_v24  ;;  %659 = vmatprep.subr.mxu1 %v2477_v25  ;;  %v362_v41 = vrot.slane %v3020_v34, 1  ;;  %v363_v42 = vrot.slane %v3022_v35, 1  ;;  %v2468_v43 = vld [vmem:[%s4335_s1 + $0x130] sm:$0xff]  ;;  %v365_v45 = vrot.slane %v279_v36, 1  ;;  %v3043_v46 = vunpack.c.l.bf16 %v256_v39  ;;  %v334_v50 = vld [vmem:[%s4335_s1 + $0x108] sm:$0xff]  ;;  %v336_v51 = vld [vmem:[%s4335_s1 + $0x118] sm:$0xff] }
  0x19   : > { %499 = vmatpush1.msra.mxu0 %v2474_v26  ;;  %660 = vmatpush1.msra.mxu1 %v2476_v27  ;;  %v3045_v47 = vunpack.c.h.bf16 %v256_v39  ;;  %v333_v52 = vld [vmem:[%s4335_s1 + $0x100] sm:$0xff]  ;;  %v335_v53 = vld [vmem:[%s4335_s1 + $0x110] sm:$0xff]  ;;  %v282_v57 = vunpack.c.l.bf16 %v3049_v49  ;;  %v2656_v58 = vld [vmem:[%s2990_s8 + $0x18] sm:$0xff]  }
  0x1a   : > { %500 = vmatprep.subr.mxu0 %v2471_v28  ;;  %661 = vmatprep.subr.mxu1 %v2473_v29  ;;  %v364_v44 = vsel %vm361_vm0, %v362_v41, %v363_v42  ;;  %v366_v54 = vsel %vm361_vm0, %v363_v42, %v365_v45  ;;  %v367_v55 = vrot.slane %v3043_v46, 1  ;;  %v330_v59 = vld [vmem:[%s4335_s1 + $0xe8] sm:$0xff]  ;;  %v332_v60 = vld [vmem:[%s4335_s1 + $0xf8] sm:$0xff]  ;;  %v329_v61 = vld [vmem:[%s4335_s1 + $0xe0] sm:$0xff]  ;;  %v3092_v1 = vunpack.c.l.bf16 %v2656_v58 }
  0x1b   : > { %501 = vmatpush1.msra.mxu0 %v2470_v32  ;;  %662 = vmatpush1.msra.mxu1 %v2472_v33  ;;  %v368_v56 = vrot.slane %v3045_v47, 1  ;;  %v331_v62 = vld [vmem:[%s4335_s1 + $0xf0] sm:$0xff]  ;;  %v370_v0 = vrot.slane %v282_v57, 1  ;;  %v3094_v2 = vunpack.c.h.bf16 %v2656_v58  ;;  %v3097_v3 = vld [vmem:[%s2990_s8 + $0x20] sm:$0x1]  ;;  %v326_v4 = vld [vmem:[%s4335_s1 + $0xc8] sm:$0xff] }
  0x1c   : > { %502 = vmatprep.subr.mxu0 %v2467_v37  ;;  %663 = vmatprep.subr.mxu1 %v2469_v38  ;;  %v328_v5 = vld [vmem:[%s4335_s1 + $0xd8] sm:$0xff]  ;;  %v325_v6 = vld [vmem:[%s4335_s1 + $0xc0] sm:$0xff]  ;;  %v327_v7 = vld [vmem:[%s4335_s1 + $0xd0] sm:$0xff]  ;;  %v372_v9 = vrot.slane %v3092_v1, 1  ;;  %v285_v11 = vunpack.c.l.bf16 %v3097_v3 }
  0x1d   : > { %503 = vmatpush1.msra.mxu0 %v2466_v40  ;;  %536 = vmatprep.mubr.f32.mxu0 %v4341_v48  ;;  %v369_v63 = vsel %vm361_vm0, %v367_v55, %v368_v56  ;;  %v371_v8 = vsel %vm361_vm0, %v368_v56, %v370_v0  ;;  %v373_v10 = vrot.slane %v3094_v2, 1  ;;  %v262_v12 = vld [vmem:[%s2990_s8 + $0x24] sm:$0xff]   ;;  %v324_v14 = vld [vmem:[%s4335_s1 + $0xb8] sm:$0xff]  ;;  %v323_v16 = vld [vmem:[%s4335_s1 + $0xb0] sm:$0xff] }
  0x1e   : > { %664 = vmatpush1.msra.mxu1 %v2468_v43  ;;  %697 = vmatprep.mubr.f32.mxu1 %v4341_v48  ;;  %v322_v13 = vld [vmem:[%s4335_s1 + $0xa8] sm:$0xff]  ;;  %v321_v15 = vld [vmem:[%s4335_s1 + $0xa0] sm:$0xff]  ;;  %v375_v18 = vrot.slane %v285_v11, 1  ;;  %v3139_v19 = vunpack.c.l.bf16 %v262_v12  ;;  %v3141_v20 = vunpack.c.h.bf16 %v262_v12  ;;  %v320_v23 = vld [vmem:[%s4335_s1 + $0x98] sm:$0xff] }
  0x1f   : > { %2502 = vmatmul.mubr.msk.f32.vlgmr.msra.gmra.mxu0 %vm439_vm1, %v364_v44  ;;  %2518 = vmatmul.mubr.msk.f32.vlgmr.msra.gmra.mxu1 %vm439_vm1, %v364_v44  ;;  %v374_v17 = vsel %vm361_vm0, %v372_v9, %v373_v10  ;;  %v3144_v21 = vld [vmem:[%s2990_s8 + $0x2c] sm:$0x1]  ;;  %v317_v24 = vld [vmem:[%s4335_s1 + $0x80] sm:$0xff]  ;;  %v319_v25 = vld [vmem:[%s4335_s1 + $0x90] sm:$0xff] }
  0x20   : > { %542 = vmatprep.mubr.f32.mxu0 %v4341_v48  ;;  %703 = vmatprep.mubr.f32.mxu1 %v4341_v48  ;;  %v318_v22 = vld [vmem:[%s4335_s1 + $0x88] sm:$0xff]  ;;  %v376_v26 = vsel %vm361_vm0, %v373_v10, %v375_v18  ;;  %v377_v27 = vrot.slane %v3139_v19, 1  ;;  %v378_v28 = vrot.slane %v3141_v20, 1  ;;  %v288_v29 = vunpack.c.l.bf16 %v3144_v21  ;;  %v2657_v30 = vld [vmem:[%s2990_s8 + $0x30] sm:$0xff]   ;;  %v316_v33 = vld [vmem:[%s4335_s1 + $0x78] sm:$0xff] }
  0x21   : > { %840 = vmatprep.subr.mxu0 %v334_v50  ;;  %1001 = vmatprep.subr.mxu1 %v336_v51  ;;  %v314_v32 = vld [vmem:[%s4335_s1 + $0x68] sm:$0xff]  ;;  %v313_v37 = vld [vmem:[%s4335_s1 + $0x60] sm:$0xff]  ;;  %v315_v38 = vld [vmem:[%s4335_s1 + $0x70] sm:$0xff]  ;;  %v3186_v41 = vunpack.c.l.bf16 %v2657_v30  ;;  %v3188_v42 = vunpack.c.h.bf16 %v2657_v30 }
  0x22   : > { %841 = vmatpush1.msra.mxu0 %v333_v52  ;;  %1002 = vmatpush1.msra.mxu1 %v335_v53  ;;  %v379_v39 = vsel %vm361_vm0, %v377_v27, %v378_v28  ;;  %v380_v40 = vrot.slane %v288_v29, 1  ;;  %v3191_v43 = vld [vmem:[%s2990_s8 + $0x38] sm:$0x1]  ;;  %v310_v44 = vld [vmem:[%s4335_s1 + $0x48] sm:$0xff]  ;;  %v309_v50 = vld [vmem:[%s4335_s1 + $0x40] sm:$0xff] }
  0x23   : > { %2503 = vmatmul.mubr.msk.f32.gmra.mxu0 %vm439_vm1, %v366_v54  ;;  %2519 = vmatmul.mubr.msk.f32.gmra.mxu1 %vm439_vm1, %v366_v54  ;;  %v312_v45 = vld [vmem:[%s4335_s1 + $0x58] sm:$0xff]  ;;  %v311_v51 = vld [vmem:[%s4335_s1 + $0x50] sm:$0xff]  ;;  %v382_v53 = vrot.slane %v3186_v41, 1  ;;  %v383_v54 = vrot.slane %v3188_v42, 1  ;;  %v291_v55 = vunpack.c.l.bf16 %v3191_v43  ;;  %v306_v58 = vld [vmem:[%s4335_s1 + $0x28] sm:$0xff] }
  0x24   : > { %548 = vmatprep.mubr.f32.mxu0 %v4341_v48  ;;  %709 = vmatprep.mubr.f32.mxu1 %v4341_v48  ;;  %v381_v52 = vsel %vm361_vm0, %v378_v28, %v380_v40  ;;  %v268_v56 = vld [vmem:[%s2990_s8 + $0x3c] sm:$0xff]   ;;  %v303_v9 = vld [vmem:[%s4335_s1 + $0x10] sm:$0xff] }
  0x25   : > { %842 = vmatprep.subr.mxu0 %v330_v59  ;;  %1003 = vmatprep.subr.mxu1 %v332_v60  ;;  %v308_v59 = vld [vmem:[%s4335_s1 + $0x38] sm:$0xff]  ;;  %v305_v60 = vld [vmem:[%s4335_s1 + $0x20] sm:$0xff]  ;;  %v3233_v0 = vunpack.c.l.bf16 %v268_v56 }
  0x26   : > { %843 = vmatpush1.msra.mxu0 %v329_v61  ;;  %1004 = vmatpush1.msra.mxu1 %v331_v62  ;;  %v307_v61 = vld [vmem:[%s4335_s1 + $0x30] sm:$0xff]  ;;  %v384_v62 = vsel %vm361_vm0, %v382_v53, %v383_v54  ;;  %v3302_v40 = vld [vmem:[%s2990_s8 + $0x5c] sm:$0x1] }
  0x27   : > { %2504 = vmatmul.mubr.msk.f32.gmra.mxu0 %vm439_vm1, %v369_v63  ;;  %2520 = vmatmul.mubr.msk.f32.gmra.mxu1 %vm439_vm1, %v369_v63  ;;  %v385_v63 = vrot.slane %v291_v55, 1  ;;  %v387_v12 = vrot.slane %v3233_v0, 1 }
  0x28   : > { %554 = vmatprep.mubr.f32.mxu0 %v4341_v48  ;;  %715 = vmatprep.mubr.f32.mxu1 %v4341_v48 }
  0x29   : > { %844 = vmatprep.subr.mxu0 %v326_v4  ;;  %1005 = vmatprep.subr.mxu1 %v328_v5  ;;  %v3235_v4 = vunpack.c.h.bf16 %v268_v56  ;;  %v3238_v5 = vld [vmem:[%s2990_s8 + $0x44] sm:$0x1]  ;;  %v386_v10 = vsel %vm361_vm0, %v383_v54, %v385_v63  ;;  %v2591_v63 = vld [vmem:[%s4335_s1 + $0x308] sm:$0xff] }
  0x2a   : > { %845 = vmatpush1.msra.mxu0 %v325_v6  ;;  %1006 = vmatpush1.msra.mxu1 %v327_v7  ;;  %v302_v6 = vld [vmem:[%s4335_s1 + $0x8] sm:$0xff]  ;;  %v304_v7 = vld [vmem:[%s4335_s1 + $0x18] sm:$0xff]  ;;  %v2598_v56 = vld [vmem:[%s4335_s1 + $0x340] sm:$0xff] }
  0x2b   : > { %2505 = vmatmul.mubr.msk.f32.gmra.mxu0 %vm439_vm1, %v371_v8  ;;  %2521 = vmatmul.mubr.msk.f32.gmra.mxu1 %vm439_vm1, %v371_v8  ;;  %v301_v8 = vld [vmem:[%s4335_s1] sm:$0xff] }
  0x2c   : > { %560 = vmatprep.mubr.f32.mxu0 %v4341_v48  ;;  %721 = vmatprep.mubr.f32.mxu1 %v4341_v48 }
  0x2d   : > { %846 = vmatprep.subr.mxu0 %v322_v13  ;;  %1007 = vmatprep.subr.mxu1 %v324_v14  ;;  %v388_v13 = vrot.slane %v3235_v4, 1  ;;  %v294_v14 = vunpack.c.l.bf16 %v3238_v5  ;;  %v1857_v5 = vld [vmem:[%s4337_s3 + $0x1f8] sm:$0xff] }
  0x2e   : > { %847 = vmatpush1.msra.mxu0 %v321_v15  ;;  %1008 = vmatpush1.msra.mxu1 %v323_v16  ;;  %v2658_v15 = vld [vmem:[%s2990_s8 + $0x48] sm:$0xff]  }
  0x2f   : > { %2506 = vmatmul.mubr.msk.f32.gmra.mxu0 %vm439_vm1, %v374_v17  ;;  %2522 = vmatmul.mubr.msk.f32.gmra.mxu1 %vm439_vm1, %v374_v17  ;;  %v2599_v16 = vld [vmem:[%s4335_s1 + $0x348] sm:$0xff]  ;;  %v2601_v17 = vld [vmem:[%s4335_s1 + $0x358] sm:$0xff]  ;;  %v389_v18 = vsel %vm361_vm0, %v387_v12, %v388_v13  ;;  %v2586_v12 = vld [vmem:[%s4335_s1 + $0x2e0] sm:$0xff] }
  0x30   : > { %566 = vmatprep.mubr.f32.mxu0 %v4341_v48  ;;  %727 = vmatprep.mubr.f32.mxu1 %v4341_v48 }
  0x31   : > { %848 = vmatprep.subr.mxu0 %v318_v22  ;;  %1009 = vmatprep.subr.mxu1 %v320_v23  ;;  %v390_v22 = vrot.slane %v294_v14, 1  ;;  %v3274_v23 = vunpack.c.l.bf16 %v2658_v15 }
  0x32   : > { %849 = vmatpush1.msra.mxu0 %v317_v24  ;;  %1010 = vmatpush1.msra.mxu1 %v319_v25  ;;  %v3276_v24 = vunpack.c.h.bf16 %v2658_v15  ;;  %v3279_v25 = vld [vmem:[%s2990_s8 + $0x50] sm:$0x1]  ;;  %v2583_v15 = vld [vmem:[%s4335_s1 + $0x2c8] sm:$0xff] }
  0x33   : > { %2507 = vmatmul.mubr.msk.f32.gmra.mxu0 %vm439_vm1, %v376_v26  ;;  %2523 = vmatmul.mubr.msk.f32.gmra.mxu1 %vm439_vm1, %v376_v26  ;;  %v391_v26 = vsel %vm361_vm0, %v388_v13, %v390_v22  ;;  %v392_v27 = vrot.slane %v3274_v23, 1  ;;  %v297_v30 = vunpack.c.l.bf16 %v3279_v25  ;;  %v2588_v13 = vld [vmem:[%s4335_s1 + $0x2f0] sm:$0xff]  ;;  %v2579_v22 = vld [vmem:[%s4335_s1 + $0x2a8] sm:$0xff] }
  0x34   : > { %572 = vmatprep.mubr.f32.mxu0 %v4341_v48  ;;  %733 = vmatprep.mubr.f32.mxu1 %v4341_v48  ;;  %v393_v28 = vrot.slane %v3276_v24, 1  ;;  %v1807_v25 = vld [vmem:[%s4337_s3 + $0x68] sm:$0xff] }
  0x35   : > { %850 = vmatprep.subr.mxu0 %v314_v32  ;;  %1011 = vmatprep.subr.mxu1 %v316_v33  ;;  %v274_v32 = vld [vmem:[%s2990_s8 + $0x54] sm:$0xff]  }
  0x36   : > { %851 = vmatpush1.msra.mxu0 %v313_v37  ;;  %1012 = vmatpush1.msra.mxu1 %v315_v38  ;;  %v394_v33 = vsel %vm361_vm0, %v392_v27, %v393_v28  ;;  %v395_v37 = vrot.slane %v297_v30, 1  ;;  %v3297_v38 = vunpack.c.l.bf16 %v274_v32  ;;  %v2578_v27 = vld [vmem:[%s4335_s1 + $0x2a0] sm:$0xff] }
  0x37   : > { %2508 = vmatmul.mubr.msk.f32.gmra.mxu0 %vm439_vm1, %v379_v39  ;;  %2524 = vmatmul.mubr.msk.f32.gmra.mxu1 %vm439_vm1, %v379_v39  ;;  %v3299_v39 = vunpack.c.h.bf16 %v274_v32  ;;  %v2575_v32 = vld [vmem:[%s4335_s1 + $0x288] sm:$0xff] }
  0x38   : > { %578 = vmatprep.mubr.f32.mxu0 %v4341_v48  ;;  %739 = vmatprep.mubr.f32.mxu1 %v4341_v48 }
  0x39   : > { %852 = vmatprep.subr.mxu0 %v310_v44  ;;  %1013 = vmatprep.subr.mxu1 %v312_v45  ;;  %v396_v44 = vsel %vm361_vm0, %v393_v28, %v395_v37  ;;  %v397_v45 = vrot.slane %v3297_v38, 1  ;;  %v2580_v28 = vld [vmem:[%s4335_s1 + $0x2b0] sm:$0xff]  ;;  %v2574_v37 = vld [vmem:[%s4335_s1 + $0x280] sm:$0xff] }
  0x3a   : > { %853 = vmatpush1.msra.mxu0 %v309_v50  ;;  %1014 = vmatpush1.msra.mxu1 %v311_v51  ;;  %v398_v50 = vrot.slane %v3299_v39, 1  ;;  %v300_v51 = vunpack.c.l.bf16 %v3302_v40  ;;  %v1805_v40 = vld [vmem:[%s4337_s3 + $0x58] sm:$0xff] }
  0x3b   : > { %2509 = vmatmul.mubr.msk.f32.gmra.mxu0 %vm439_vm1, %v381_v52  ;;  %2525 = vmatmul.mubr.msk.f32.gmra.mxu1 %vm439_vm1, %v381_v52 }
  0x3c   : > { %584 = vmatprep.mubr.f32.mxu0 %v4341_v48  ;;  %745 = vmatprep.mubr.f32.mxu1 %v4341_v48  ;;  %v399_v52 = vsel %vm361_vm0, %v397_v45, %v398_v50  ;;  %v400_v53 = vrot.slane %v300_v51, 1  ;;  %v2571_v45 = vld [vmem:[%s4335_s1 + $0x268] sm:$0xff] }
  0x3d   : > { %854 = vmatprep.subr.mxu0 %v306_v58  ;;  %1015 = vmatprep.subr.mxu1 %v308_v59  ;;  %v2600_v58 = vld [vmem:[%s4335_s1 + $0x350] sm:$0xff]  ;;  %v2595_v59 = vld [vmem:[%s4335_s1 + $0x328] sm:$0xff] }
  0x3e   : > { %855 = vmatpush1.msra.mxu0 %v305_v60  ;;  %1016 = vmatpush1.msra.mxu1 %v307_v61  ;;  %v401_v54 = vsel %vm361_vm0, %v398_v50, %v400_v53  ;;  %v2597_v60 = vld [vmem:[%s4335_s1 + $0x338] sm:$0xff]  ;;  %v2594_v61 = vld [vmem:[%s4335_s1 + $0x320] sm:$0xff]  ;;  %v2572_v53 = vld [vmem:[%s4335_s1 + $0x270] sm:$0xff] }
  0x3f   : > { %2510 = vmatmul.mubr.msk.f32.gmra.mxu0 %vm439_vm1, %v384_v62  ;;  %2526 = vmatmul.mubr.msk.f32.gmra.mxu1 %vm439_vm1, %v384_v62  ;;  %v2596_v62 = vld [vmem:[%s4335_s1 + $0x330] sm:$0xff]  ;;  %v2573_v50 = vld [vmem:[%s4335_s1 + $0x278] sm:$0xff] }
  0x40   : > { %590 = vmatprep.mubr.f32.mxu0 %v4341_v48  ;;  %751 = vmatprep.mubr.f32.mxu1 %v4341_v48 }
  0x41   : > { %856 = vmatprep.subr.mxu0 %v302_v6  ;;  %1017 = vmatprep.subr.mxu1 %v304_v7  ;;  %v2593_v6 = vld [vmem:[%s4335_s1 + $0x318] sm:$0xff]  ;;  %v2590_v7 = vld [vmem:[%s4335_s1 + $0x300] sm:$0xff] }
  0x42   : > { %857 = vmatpush1.msra.mxu0 %v301_v8  ;;  %1018 = vmatpush1.msra.mxu1 %v303_v9  ;;  %v2592_v8 = vld [vmem:[%s4335_s1 + $0x310] sm:$0xff]  ;;  %v2587_v9 = vld [vmem:[%s4335_s1 + $0x2e8] sm:$0xff] }
  0x43   : > { %2511 = vmatmul.mubr.msk.f32.gmra.mxu0 %vm439_vm1, %v386_v10  ;;  %2527 = vmatmul.mubr.msk.f32.gmra.mxu1 %vm439_vm1, %v386_v10  ;;  %v2589_v10 = vld [vmem:[%s4335_s1 + $0x2f8] sm:$0xff] }
  0x44   : > { %596 = vmatprep.mubr.f32.mxu0 %v4341_v48  ;;  %757 = vmatprep.mubr.f32.mxu1 %v4341_v48 }
  0x45   : > { %1272 = vmatprep.subr.mxu0 %v2599_v16  ;;  %1433 = vmatprep.subr.mxu1 %v2601_v17  ;;  %v2585_v16 = vld [vmem:[%s4335_s1 + $0x2d8] sm:$0xff]  ;;  %v2582_v17 = vld [vmem:[%s4335_s1 + $0x2c0] sm:$0xff] }
  0x47   : > { %2512 = vmatmul.mubr.msk.f32.gmra.mxu0 %vm439_vm1, %v389_v18  ;;  %2528 = vmatmul.mubr.msk.f32.gmra.mxu1 %vm439_vm1, %v389_v18  ;;  %v2584_v18 = vld [vmem:[%s4335_s1 + $0x2d0] sm:$0xff] }
  0x48   : > { %602 = vmatprep.mubr.f32.mxu0 %v4341_v48  ;;  %763 = vmatprep.mubr.f32.mxu1 %v4341_v48 }
  0x4b   : > { %2513 = vmatmul.mubr.msk.f32.gmra.mxu0 %vm439_vm1, %v391_v26  ;;  %2529 = vmatmul.mubr.msk.f32.gmra.mxu1 %vm439_vm1, %v391_v26  ;;  %v2581_v26 = vld [vmem:[%s4335_s1 + $0x2b8] sm:$0xff] }
  0x4c   : > { %608 = vmatprep.mubr.f32.mxu0 %v4341_v48  ;;  %769 = vmatprep.mubr.f32.mxu1 %v4341_v48 }
  0x4f   : > { %2514 = vmatmul.mubr.msk.f32.gmra.mxu0 %vm439_vm1, %v394_v33  ;;  %2530 = vmatmul.mubr.msk.f32.gmra.mxu1 %vm439_vm1, %v394_v33  ;;  %v2577_v33 = vld [vmem:[%s4335_s1 + $0x298] sm:$0xff] }
  0x50   : > { %614 = vmatprep.mubr.f32.mxu0 %v4341_v48  ;;  %775 = vmatprep.mubr.f32.mxu1 %v4341_v48 }
  0x53   : > { %2515 = vmatmul.mubr.msk.f32.gmra.mxu0 %vm439_vm1, %v396_v44  ;;  %2531 = vmatmul.mubr.msk.f32.gmra.mxu1 %vm439_vm1, %v396_v44  ;;  %v2576_v44 = vld [vmem:[%s4335_s1 + $0x290] sm:$0xff] }
  0x54   : > { %620 = vmatprep.mubr.f32.mxu0 %v4341_v48  ;;  %781 = vmatprep.mubr.f32.mxu1 %v4341_v48 }
  0x57   : > { %2516 = vmatmul.mubr.msk.f32.gmra.mxu0 %vm439_vm1, %v399_v52  ;;  %2532 = vmatmul.mubr.msk.f32.gmra.mxu1 %vm439_vm1, %v399_v52  ;;  %v2570_v52 = vld [vmem:[%s4335_s1 + $0x260] sm:$0xff] }
  0x58   : > { %626 = vmatprep.mubr.f32.mxu0 %v4341_v48  ;;  %787 = vmatprep.mubr.f32.mxu1 %v4341_v48 }
  0x5b   : > { %2517 = vmatmul.mubr.msk.f32.gmra.mxu0 %vm439_vm1, %v401_v54  ;;  %2533 = vmatmul.mubr.msk.f32.gmra.mxu1 %vm439_vm1, %v401_v54  ;;  %v2567_v54 = vld [vmem:[%s4335_s1 + $0x248] sm:$0xff] }
  0x5c   : > { %890 = vmatprep.mubr.f32.mxu0 %v4341_v48  ;;  %1051 = vmatprep.mubr.f32.mxu1 %v4341_v48 }
  0x5f   : > { %2534 = vmatmul.mubr.msk.f32.vlgmr.msra.gmra.mxu0 %vm439_vm1, %v3020_v34  ;;  %2550 = vmatmul.mubr.msk.f32.vlgmr.msra.gmra.mxu1 %vm439_vm1, %v3020_v34 }
  0x60   : > { %896 = vmatprep.mubr.f32.mxu0 %v4341_v48  ;;  %1057 = vmatprep.mubr.f32.mxu1 %v4341_v48 }
  0x61   : > { %1273 = vmatpush1.msra.mxu0 %v2598_v56  ;;  %1434 = vmatpush1.msra.mxu1 %v2600_v58  ;;  %v2569_v56 = vld [vmem:[%s4335_s1 + $0x258] sm:$0xff]  ;;  %v2566_v58 = vld [vmem:[%s4335_s1 + $0x240] sm:$0xff] }
  0x62   : > { %1274 = vmatprep.subr.mxu0 %v2595_v59  ;;  %1435 = vmatprep.subr.mxu1 %v2597_v60  ;;  %v2568_v59 = vld [vmem:[%s4335_s1 + $0x250] sm:$0xff]  ;;  %v1149_v60 = vrot.slane %v3020_v34, 2 }
  0x63   : > { %2535 = vmatmul.mubr.msk.f32.gmra.mxu0 %vm439_vm1, %v3022_v35  ;;  %2551 = vmatmul.mubr.msk.f32.gmra.mxu1 %vm439_vm1, %v3022_v35 }
  0x64   : > { %902 = vmatprep.mubr.f32.mxu0 %v4341_v48  ;;  %1063 = vmatprep.mubr.f32.mxu1 %v4341_v48 }
  0x65   : > { %1275 = vmatpush1.msra.mxu0 %v2594_v61  ;;  %1436 = vmatpush1.msra.mxu1 %v2596_v62  ;;  %v1150_v61 = vrot.slane %v3022_v35, 2  ;;  %v1154_v35 = vrot.slane %v3043_v46, 2 }
  0x66   : > { %1276 = vmatprep.subr.mxu0 %v2591_v63  ;;  %1437 = vmatprep.subr.mxu1 %v2593_v6  ;;  %v1152_v63 = vrot.slane %v279_v36, 2  ;;  %v1155_v6 = vrot.slane %v3045_v47, 2  ;;  %v1157_v36 = vrot.slane %v282_v57, 2  ;;  %v1162_v57 = vrot.slane %v285_v11, 2 }
  0x67   : > { %2536 = vmatmul.mubr.msk.f32.gmra.mxu0 %vm439_vm1, %v3043_v46  ;;  %2552 = vmatmul.mubr.msk.f32.gmra.mxu1 %vm439_vm1, %v3043_v46  ;;  %v1151_v62 = vsel %vm1148_vm2, %v1149_v60, %v1150_v61  ;;  %v1167_v11 = vrot.slane %v288_v29, 2  ;;  %v1172_v29 = vrot.slane %v291_v55, 2  ;;  %v1177_v55 = vrot.slane %v294_v14, 2  ;;  %v1809_v14 = vld [vmem:[%s4337_s3 + $0x78] sm:$0xff]  ;;  %v1836_v60 = vld [vmem:[%s4337_s3 + $0x150] sm:$0xff] }
  0x68   : > { %908 = vmatprep.mubr.f32.mxu0 %v4341_v48  ;;  %1069 = vmatprep.mubr.f32.mxu1 %v4341_v48  ;;  %v1153_v34 = vsel %vm1148_vm2, %v1150_v61, %v1152_v63  ;;  %v1156_v31 = vsel %vm1148_vm2, %v1154_v35, %v1155_v6  ;;  %v1158_v46 = vsel %vm1148_vm2, %v1155_v6, %v1157_v36  ;;  %v1819_v61 = vld [vmem:[%s4337_s3 + $0xc8] sm:$0xff]  ;;  %v1818_v35 = vld [vmem:[%s4337_s3 + $0xc0] sm:$0xff] }
  0x69   : > { %1277 = vmatpush1.msra.mxu0 %v2590_v7  ;;  %1438 = vmatpush1.msra.mxu1 %v2592_v8  ;;  %v1160_v7 = vrot.slane %v3094_v2, 2  ;;  %v1165_v8 = vrot.slane %v3141_v20, 2  ;;  %v1803_v63 = vld [vmem:[%s4337_s3 + $0x48] sm:$0xff]  ;;  %v1850_v6 = vld [vmem:[%s4337_s3 + $0x1c0] sm:$0xff] }
  0x6a   : > { %1278 = vmatprep.subr.mxu0 %v2587_v9  ;;  %1439 = vmatprep.subr.mxu1 %v2589_v10  ;;  %v1170_v9 = vrot.slane %v3188_v42, 2  ;;  %v1175_v10 = vrot.slane %v3235_v4, 2  ;;  %v1834_v36 = vld [vmem:[%s4337_s3 + $0x140] sm:$0xff] }
  0x6b   : > { %2537 = vmatmul.mubr.msk.f32.gmra.mxu0 %vm439_vm1, %v3045_v47  ;;  %2553 = vmatmul.mubr.msk.f32.gmra.mxu1 %vm439_vm1, %v3045_v47  ;;  %v1159_v47 = vrot.slane %v3092_v1, 2 }
  0x6c   : > { %914 = vmatprep.mubr.f32.mxu0 %v4341_v48  ;;  %1075 = vmatprep.mubr.f32.mxu1 %v4341_v48 }
  0x6d   : > { %1279 = vmatpush1.msra.mxu0 %v2586_v12  ;;  %1440 = vmatpush1.msra.mxu1 %v2588_v13  ;;  %v1161_v49 = vsel %vm1148_vm2, %v1159_v47, %v1160_v7  ;;  %v1180_v12 = vrot.slane %v3276_v24, 2  ;;  %v1825_v13 = vld [vmem:[%s4337_s3 + $0xf8] sm:$0xff] }
  0x6e   : > { %1280 = vmatprep.subr.mxu0 %v2583_v15  ;;  %1441 = vmatprep.subr.mxu1 %v2585_v16  ;;  %v1856_v15 = vld [vmem:[%s4337_s3 + $0x1f0] sm:$0xff] }
  0x6f   : > { %2538 = vmatmul.mubr.msk.f32.gmra.mxu0 %vm439_vm1, %v3092_v1  ;;  %2554 = vmatmul.mubr.msk.f32.gmra.mxu1 %vm439_vm1, %v3092_v1  ;;  %v1163_v1 = vsel %vm1148_vm2, %v1160_v7, %v1162_v57  ;;  %v1808_v16 = vld [vmem:[%s4337_s3 + $0x70] sm:$0xff]  ;;  %v1817_v7 = vld [vmem:[%s4337_s3 + $0xb8] sm:$0xff] }
  0x70   : > { %920 = vmatprep.mubr.f32.mxu0 %v4341_v48  ;;  %1081 = vmatprep.mubr.f32.mxu1 %v4341_v48  ;;  %v1801_v57 = vld [vmem:[%s4337_s3 + $0x38] sm:$0xff] }
  0x71   : > { %1281 = vmatpush1.msra.mxu0 %v2582_v17  ;;  %1442 = vmatpush1.msra.mxu1 %v2584_v18  ;;  %v1840_v17 = vld [vmem:[%s4337_s3 + $0x170] sm:$0xff] }
  0x72   : > { %1282 = vmatprep.subr.mxu0 %v2579_v22  ;;  %1443 = vmatprep.subr.mxu1 %v2581_v26  ;;  %v1182_v22 = vrot.slane %v297_v30, 2  ;;  %v1823_v26 = vld [vmem:[%s4337_s3 + $0xe8] sm:$0xff] }
  0x73   : > { %2539 = vmatmul.mubr.msk.f32.gmra.mxu0 %vm439_vm1, %v3094_v2  ;;  %2555 = vmatmul.mubr.msk.f32.gmra.mxu1 %vm439_vm1, %v3094_v2  ;;  %v1164_v2 = vrot.slane %v3139_v19, 2  ;;  %v1839_v30 = vld [vmem:[%s4337_s3 + $0x168] sm:$0xff] }
  0x74   : > { %926 = vmatprep.mubr.f32.mxu0 %v4341_v48  ;;  %1087 = vmatprep.mubr.f32.mxu1 %v4341_v48 }
  0x75   : > { %1283 = vmatpush1.msra.mxu0 %v2578_v27  ;;  %1444 = vmatpush1.msra.mxu1 %v2580_v28  ;;  %v1166_v3 = vsel %vm1148_vm2, %v1164_v2, %v1165_v8  ;;  %v1855_v27 = vld [vmem:[%s4337_s3 + $0x1e8] sm:$0xff]  ;;  %v1183_v28 = vsel %vm1148_vm2, %v1180_v12, %v1182_v22  ;;  %v1812_v22 = vld [vmem:[%s4337_s3 + $0x90] sm:$0xff] }
  0x76   : > { %1284 = vmatprep.subr.mxu0 %v2575_v32  ;;  %1445 = vmatprep.subr.mxu1 %v2577_v33  ;;  %v1184_v32 = vrot.slane %v3297_v38, 2  ;;  %v1185_v33 = vrot.slane %v3299_v39, 2 }
  0x77   : > { %2540 = vmatmul.mubr.msk.f32.gmra.mxu0 %vm439_vm1, %v3139_v19  ;;  %2556 = vmatmul.mubr.msk.f32.gmra.mxu1 %vm439_vm1, %v3139_v19  ;;  %v1168_v19 = vsel %vm1148_vm2, %v1165_v8, %v1167_v11  ;;  %v1848_v11 = vld [vmem:[%s4337_s3 + $0x1b0] sm:$0xff] }
  0x78   : > { %932 = vmatprep.mubr.f32.mxu0 %v4341_v48  ;;  %1093 = vmatprep.mubr.f32.mxu1 %v4341_v48 }
  0x79   : > { %1285 = vmatpush1.msra.mxu0 %v2574_v37  ;;  %1446 = vmatpush1.msra.mxu1 %v2576_v44  ;;  %v1822_v37 = vld [vmem:[%s4337_s3 + $0xe0] sm:$0xff] }
  0x7a   : > { %1286 = vmatprep.subr.mxu0 %v2571_v45  ;;  %1447 = vmatprep.subr.mxu1 %v2573_v50  ;;  %v1854_v44 = vld [vmem:[%s4337_s3 + $0x1e0] sm:$0xff]  ;;  %v1186_v45 = vsel %vm1148_vm2, %v1184_v32, %v1185_v33  ;;  %v1187_v50 = vrot.slane %v300_v51, 2  ;;  %v1837_v51 = vld [vmem:[%s4337_s3 + $0x158] sm:$0xff]  ;;  %v1811_v32 = vld [vmem:[%s4337_s3 + $0x88] sm:$0xff] }
  0x7b   : > { %2541 = vmatmul.mubr.msk.f32.gmra.mxu0 %vm439_vm1, %v3141_v20  ;;  %2557 = vmatmul.mubr.msk.f32.gmra.mxu1 %vm439_vm1, %v3141_v20  ;;  %v1169_v20 = vrot.slane %v3186_v41, 2 }
  0x7c   : > { %938 = vmatprep.mubr.f32.mxu0 %v4341_v48  ;;  %1099 = vmatprep.mubr.f32.mxu1 %v4341_v48 }
  0x7d   : > { %1287 = vmatpush1.msra.mxu0 %v2570_v52  ;;  %1448 = vmatpush1.msra.mxu1 %v2572_v53  ;;  %v1171_v21 = vsel %vm1148_vm2, %v1169_v20, %v1170_v9  ;;  %v1821_v52 = vld [vmem:[%s4337_s3 + $0xd8] sm:$0xff]  ;;  %v1832_v20 = vld [vmem:[%s4337_s3 + $0x130] sm:$0xff] }
  0x7e   : > { %1288 = vmatprep.subr.mxu0 %v2567_v54  ;;  %1449 = vmatprep.subr.mxu1 %v2569_v56  ;;  %v1853_v53 = vld [vmem:[%s4337_s3 + $0x1d8] sm:$0xff]  ;;  %v1188_v54 = vsel %vm1148_vm2, %v1185_v33, %v1187_v50  ;;  %v1820_v56 = vld [vmem:[%s4337_s3 + $0xd0] sm:$0xff]  ;;  %v1843_v33 = vld [vmem:[%s4337_s3 + $0x188] sm:$0xff] }
  0x7f   : > { %2542 = vmatmul.mubr.msk.f32.gmra.mxu0 %vm439_vm1, %v3186_v41  ;;  %2558 = vmatmul.mubr.msk.f32.gmra.mxu1 %vm439_vm1, %v3186_v41  ;;  %v1173_v41 = vsel %vm1148_vm2, %v1170_v9, %v1172_v29  ;;  %v1815_v29 = vld [vmem:[%s4337_s3 + $0xa8] sm:$0xff]  ;;  %v1842_v50 = vld [vmem:[%s4337_s3 + $0x180] sm:$0xff] }
  0x80   : > { %944 = vmatprep.mubr.f32.mxu0 %v4341_v48  ;;  %1105 = vmatprep.mubr.f32.mxu1 %v4341_v48 }
  0x81   : > { %1289 = vmatpush1.msra.mxu0 %v2566_v58  ;;  %1450 = vmatpush1.msra.mxu1 %v2568_v59  ;;  %v1852_v58 = vld [vmem:[%s4337_s3 + $0x1d0] sm:$0xff] }
  0x82   : > { %2659 = vmatprep.subr.mxu0 %v1825_v13  ;;  %2739 = vmatprep.subr.mxu1 %v1857_v5  ;;  %v1804_v59 = vld [vmem:[%s4337_s3 + $0x50] sm:$0xff]  ;;  %v1830_v13 = vld [vmem:[%s4337_s3 + $0x120] sm:$0xff] }
  0x83   : > { %2543 = vmatmul.mubr.msk.f32.gmra.mxu0 %vm439_vm1, %v3188_v42  ;;  %2559 = vmatmul.mubr.msk.f32.gmra.mxu1 %vm439_vm1, %v3188_v42  ;;  %v1174_v42 = vrot.slane %v3233_v0, 2 }
  0x84   : > { %950 = vmatprep.mubr.f32.mxu0 %v4341_v48  ;;  %1111 = vmatprep.mubr.f32.mxu1 %v4341_v48 }
  0x85   : > { %v1176_v43 = vsel %vm1148_vm2, %v1174_v42, %v1175_v10  ;;  %v1799_v42 = vld [vmem:[%s4337_s3 + $0x28] sm:$0xff] }
  0x87   : > { %2544 = vmatmul.mubr.msk.f32.gmra.mxu0 %vm439_vm1, %v3233_v0  ;;  %2560 = vmatmul.mubr.msk.f32.gmra.mxu1 %vm439_vm1, %v3233_v0  ;;  %v1178_v0 = vsel %vm1148_vm2, %v1175_v10, %v1177_v55  ;;  %v1831_v10 = vld [vmem:[%s4337_s3 + $0x128] sm:$0xff] }
  0x88   : > { %956 = vmatprep.mubr.f32.mxu0 %v4341_v48  ;;  %1117 = vmatprep.mubr.f32.mxu1 %v4341_v48 }
  0x8b   : > { %2545 = vmatmul.mubr.msk.f32.gmra.mxu0 %vm439_vm1, %v3235_v4  ;;  %2561 = vmatmul.mubr.msk.f32.gmra.mxu1 %vm439_vm1, %v3235_v4  ;;  %v1179_v4 = vrot.slane %v3274_v23, 2 }
  0x8c   : > { %962 = vmatprep.mubr.f32.mxu0 %v4341_v48  ;;  %1123 = vmatprep.mubr.f32.mxu1 %v4341_v48 }
  0x8d   : > { %v1181_v18 = vsel %vm1148_vm2, %v1179_v4, %v1180_v12  ;;  %v1846_v4 = vld [vmem:[%s4337_s3 + $0x1a0] sm:$0xff] }
  0x8e   : > { %v1798_v12 = vld [vmem:[%s4337_s3 + $0x20] sm:$0xff] }
  0x8f   : > { %2546 = vmatmul.mubr.msk.f32.gmra.mxu0 %vm439_vm1, %v3274_v23  ;;  %2562 = vmatmul.mubr.msk.f32.gmra.mxu1 %vm439_vm1, %v3274_v23  ;;  %v1841_v23 = vld [vmem:[%s4337_s3 + $0x178] sm:$0xff] }
  0x90   : > { %968 = vmatprep.mubr.f32.mxu0 %v4341_v48  ;;  %1129 = vmatprep.mubr.f32.mxu1 %v4341_v48 }
  0x93   : > { %2547 = vmatmul.mubr.msk.f32.gmra.mxu0 %vm439_vm1, %v3276_v24  ;;  %2563 = vmatmul.mubr.msk.f32.gmra.mxu1 %vm439_vm1, %v3276_v24  ;;  %v1824_v24 = vld [vmem:[%s4337_s3 + $0xf0] sm:$0xff] }
  0x94   : > { %974 = vmatprep.mubr.f32.mxu0 %v4341_v48  ;;  %1135 = vmatprep.mubr.f32.mxu1 %v4341_v48 }
  0x97   : > { %2548 = vmatmul.mubr.msk.f32.gmra.mxu0 %vm439_vm1, %v3297_v38  ;;  %2564 = vmatmul.mubr.msk.f32.gmra.mxu1 %vm439_vm1, %v3297_v38  ;;  %v1806_v38 = vld [vmem:[%s4337_s3 + $0x60] sm:$0xff] }
  0x98   : > { %980 = vmatprep.mubr.f32.mxu0 %v4341_v48  ;;  %1141 = vmatprep.mubr.f32.mxu1 %v4341_v48 }
  0x9b   : > { %2549 = vmatmul.mubr.msk.f32.gmra.mxu0 %vm439_vm1, %v3299_v39  ;;  %2565 = vmatmul.mubr.msk.f32.gmra.mxu1 %vm439_vm1, %v3299_v39  ;;  %v1838_v39 = vld [vmem:[%s4337_s3 + $0x160] sm:$0xff] }
  0x9c   : > { %1322 = vmatprep.mubr.f32.mxu0 %v4341_v48  ;;  %1483 = vmatprep.mubr.f32.mxu1 %v4341_v48 }
  0x9f   : > { %2602 = vmatmul.mubr.msk.f32.vlgmr.msra.gmra.mxu0 %vm439_vm1, %v1151_v62  ;;  %2618 = vmatmul.mubr.msk.f32.vlgmr.msra.gmra.mxu1 %vm439_vm1, %v1151_v62  ;;  %v1851_v62 = vld [vmem:[%s4337_s3 + $0x1c8] sm:$0xff] }
  0xa0   : > { %1328 = vmatprep.mubr.f32.mxu0 %v4341_v48  ;;  %1489 = vmatprep.mubr.f32.mxu1 %v4341_v48 }
  0xa1   : > { %2660 = vmatpush3.msra.mxu0 %v1809_v14  ;;  %2740 = vmatpush3.msra.mxu1 %v1841_v23  ;;  %v1813_v23 = vld [vmem:[%s4337_s3 + $0x98] sm:$0xff] }
  0xa2   : > { %2661 = vmatprep.subr.mxu0 %v1824_v24  ;;  %2741 = vmatprep.subr.mxu1 %v1856_v15  ;;  %v1845_v24 = vld [vmem:[%s4337_s3 + $0x198] sm:$0xff] }
  0xa3   : > { %2603 = vmatmul.mubr.msk.f32.gmra.mxu0 %vm439_vm1, %v1153_v34  ;;  %2619 = vmatmul.mubr.msk.f32.gmra.mxu1 %vm439_vm1, %v1153_v34  ;;  %v1835_v34 = vld [vmem:[%s4337_s3 + $0x148] sm:$0xff]  ;;  %v1797_v15 = vld [vmem:[%s4337_s3 + $0x18] sm:$0xff] }
  0xa4   : > { %1334 = vmatprep.mubr.f32.mxu0 %v4341_v48  ;;  %1495 = vmatprep.mubr.f32.mxu1 %v4341_v48 }
  0xa5   : > { %2662 = vmatpush3.msra.mxu0 %v1808_v16  ;;  %2742 = vmatpush3.msra.mxu1 %v1840_v17  ;;  %v1829_v16 = vld [vmem:[%s4337_s3 + $0x118] sm:$0xff] }
  0xa6   : > { %2663 = vmatprep.subr.mxu0 %v1823_v26  ;;  %2743 = vmatprep.subr.mxu1 %v1855_v27  ;;  %v1844_v26 = vld [vmem:[%s4337_s3 + $0x190] sm:$0xff] }
  0xa7   : > { %2604 = vmatmul.mubr.msk.f32.gmra.mxu0 %vm439_vm1, %v1156_v31  ;;  %2620 = vmatmul.mubr.msk.f32.gmra.mxu1 %vm439_vm1, %v1156_v31  ;;  %v1802_v31 = vld [vmem:[%s4337_s3 + $0x40] sm:$0xff]  ;;  %v1796_v27 = vld [vmem:[%s4337_s3 + $0x10] sm:$0xff] }
  0xa8   : > { %1340 = vmatprep.mubr.f32.mxu0 %v4341_v48  ;;  %1501 = vmatprep.mubr.f32.mxu1 %v4341_v48 }
  0xa9   : > { %2664 = vmatpush3.msra.mxu0 %v1807_v25  ;;  %2744 = vmatpush3.msra.mxu1 %v1839_v30  ;;  %v1828_v25 = vld [vmem:[%s4337_s3 + $0x110] sm:$0xff] }
  0xaa   : > { %2665 = vmatprep.subr.mxu0 %v1822_v37  ;;  %2745 = vmatprep.subr.mxu1 %v1854_v44  ;;  %v1795_v37 = vld [vmem:[%s4337_s3 + $0x8] sm:$0xff] }
  0xab   : > { %2605 = vmatmul.mubr.msk.f32.gmra.mxu0 %vm439_vm1, %v1158_v46  ;;  %2621 = vmatmul.mubr.msk.f32.gmra.mxu1 %vm439_vm1, %v1158_v46  ;;  %v1827_v44 = vld [vmem:[%s4337_s3 + $0x108] sm:$0xff] }
  0xac   : > { %1346 = vmatprep.mubr.f32.mxu0 %v4341_v48  ;;  %1507 = vmatprep.mubr.f32.mxu1 %v4341_v48 }
  0xad   : > { %2666 = vmatpush3.msra.mxu0 %v1806_v38  ;;  %2746 = vmatpush3.msra.mxu1 %v1838_v39 }
  0xae   : > { %2667 = vmatprep.subr.mxu0 %v1821_v52  ;;  %2747 = vmatprep.subr.mxu1 %v1853_v53  ;;  %v1794_v52 = vld [vmem:[%s4337_s3] sm:$0xff] }
  0xaf   : > { %2606 = vmatmul.mubr.msk.f32.gmra.mxu0 %vm439_vm1, %v1161_v49  ;;  %2622 = vmatmul.mubr.msk.f32.gmra.mxu1 %vm439_vm1, %v1161_v49  ;;  %v1849_v49 = vld [vmem:[%s4337_s3 + $0x1b8] sm:$0xff]  ;;  %v1826_v53 = vld [vmem:[%s4337_s3 + $0x100] sm:$0xff] }
  0xb0   : > { %1352 = vmatprep.mubr.f32.mxu0 %v4341_v48  ;;  %1513 = vmatprep.mubr.f32.mxu1 %v4341_v48 }
  0xb1   : > { %2668 = vmatpush3.msra.mxu0 %v1805_v40  ;;  %2748 = vmatpush3.msra.mxu1 %v1837_v51 }
  0xb2   : > { %2669 = vmatprep.subr.mxu0 %v1820_v56  ;;  %2749 = vmatprep.subr.mxu1 %v1852_v58 }
  0xb3   : > { %2607 = vmatmul.mubr.msk.f32.gmra.mxu0 %vm439_vm1, %v1163_v1  ;;  %2623 = vmatmul.mubr.msk.f32.gmra.mxu1 %vm439_vm1, %v1163_v1  ;;  %v1833_v1 = vld [vmem:[%s4337_s3 + $0x138] sm:$0xff] }
  0xb4   : > { %1358 = vmatprep.mubr.f32.mxu0 %v4341_v48  ;;  %1519 = vmatprep.mubr.f32.mxu1 %v4341_v48 }
  0xb5   : > { %2670 = vmatpush3.msra.mxu0 %v1804_v59  ;;  %2750 = vmatpush3.msra.mxu1 %v1836_v60 }
  0xb6   : > { %2671 = vmatprep.subr.mxu0 %v1819_v61  ;;  %2751 = vmatprep.subr.mxu1 %v1851_v62 }
  0xb7   : > { %2608 = vmatmul.mubr.msk.f32.gmra.mxu0 %vm439_vm1, %v1166_v3  ;;  %2624 = vmatmul.mubr.msk.f32.gmra.mxu1 %vm439_vm1, %v1166_v3  ;;  %v1816_v3 = vld [vmem:[%s4337_s3 + $0xb0] sm:$0xff] }
  0xb8   : > { %1364 = vmatprep.mubr.f32.mxu0 %v4341_v48  ;;  %1525 = vmatprep.mubr.f32.mxu1 %v4341_v48 }
  0xb9   : > { %2672 = vmatpush3.msra.mxu0 %v1803_v63  ;;  %2752 = vmatpush3.msra.mxu1 %v1835_v34 }
  0xba   : > { %2673 = vmatprep.subr.mxu0 %v1818_v35  ;;  %2753 = vmatprep.subr.mxu1 %v1850_v6 }
  0xbb   : > { %2609 = vmatmul.mubr.msk.f32.gmra.mxu0 %vm439_vm1, %v1168_v19  ;;  %2625 = vmatmul.mubr.msk.f32.gmra.mxu1 %vm439_vm1, %v1168_v19  ;;  %v1800_v19 = vld [vmem:[%s4337_s3 + $0x30] sm:$0xff] }
  0xbc   : > { %1370 = vmatprep.mubr.f32.mxu0 %v4341_v48  ;;  %1531 = vmatprep.mubr.f32.mxu1 %v4341_v48 }
  0xbd   : > { %2674 = vmatpush3.msra.mxu0 %v1802_v31  ;;  %2754 = vmatpush3.msra.mxu1 %v1834_v36 }
  0xbe   : > { %2675 = vmatprep.subr.mxu0 %v1817_v7  ;;  %2755 = vmatprep.subr.mxu1 %v1849_v49 }
  0xbf   : > { %2610 = vmatmul.mubr.msk.f32.gmra.mxu0 %vm439_vm1, %v1171_v21  ;;  %2626 = vmatmul.mubr.msk.f32.gmra.mxu1 %vm439_vm1, %v1171_v21 }
  0xc0   : > { %1376 = vmatprep.mubr.f32.mxu0 %v4341_v48  ;;  %1537 = vmatprep.mubr.f32.mxu1 %v4341_v48 }
  0xc1   : > { %2676 = vmatpush3.msra.mxu0 %v1801_v57  ;;  %2756 = vmatpush3.msra.mxu1 %v1833_v1 }
  0xc2   : > { %2677 = vmatprep.subr.mxu0 %v1816_v3  ;;  %2757 = vmatprep.subr.mxu1 %v1848_v11 }
  0xc3   : > { %2611 = vmatmul.mubr.msk.f32.gmra.mxu0 %vm439_vm1, %v1173_v41  ;;  %2627 = vmatmul.mubr.msk.f32.gmra.mxu1 %vm439_vm1, %v1173_v41  ;;  %v1847_v41 = vld [vmem:[%s4337_s3 + $0x1a8] sm:$0xff] }
  0xc4   : > { %1382 = vmatprep.mubr.f32.mxu0 %v4341_v48  ;;  %1543 = vmatprep.mubr.f32.mxu1 %v4341_v48 }
  0xc5   : > { %2678 = vmatpush3.msra.mxu0 %v1800_v19  ;;  %2758 = vmatpush3.msra.mxu1 %v1832_v20 }
  0xc6   : > { %2679 = vmatprep.subr.mxu0 %v1815_v29  ;;  %2759 = vmatprep.subr.mxu1 %v1847_v41 }
  0xc7   : > { %2612 = vmatmul.mubr.msk.f32.gmra.mxu0 %vm439_vm1, %v1176_v43  ;;  %2628 = vmatmul.mubr.msk.f32.gmra.mxu1 %vm439_vm1, %v1176_v43 }
  0xc8   : > { %1388 = vmatprep.mubr.f32.mxu0 %v4341_v48  ;;  %1549 = vmatprep.mubr.f32.mxu1 %v4341_v48 }
  0xc9   : > { %2680 = vmatpush3.msra.mxu0 %v1799_v42  ;;  %2760 = vmatpush3.msra.mxu1 %v1831_v10 }
  0xca   : > { %2761 = vmatprep.subr.mxu1 %v1846_v4 }
  0xcb   : > { %2613 = vmatmul.mubr.msk.f32.gmra.mxu0 %vm439_vm1, %v1178_v0  ;;  %2629 = vmatmul.mubr.msk.f32.gmra.mxu1 %vm439_vm1, %v1178_v0  ;;  %v1814_v0 = vld [vmem:[%s4337_s3 + $0xa0] sm:$0xff] }
  0xcc   : > { %1394 = vmatprep.mubr.f32.mxu0 %v4341_v48  ;;  %1555 = vmatprep.mubr.f32.mxu1 %v4341_v48 }
  0xcd   : > { %2681 = vmatprep.subr.mxu0 %v1814_v0  ;;  %2762 = vmatpush3.msra.mxu1 %v1830_v13 }
  0xce   : > { %2682 = vmatpush3.msra.mxu0 %v1798_v12  ;;  %2763 = vmatprep.subr.mxu1 %v1845_v24 }
  0xcf   : > { %2614 = vmatmul.mubr.msk.f32.gmra.mxu0 %vm439_vm1, %v1181_v18  ;;  %2630 = vmatmul.mubr.msk.f32.gmra.mxu1 %vm439_vm1, %v1181_v18 }
  0xd0   : > { %1400 = vmatprep.mubr.f32.mxu0 %v4341_v48  ;;  %1561 = vmatprep.mubr.f32.mxu1 %v4341_v48 }
  0xd1   : > { %2683 = vmatprep.subr.mxu0 %v1813_v23  ;;  %2764 = vmatpush3.msra.mxu1 %v1829_v16 }
  0xd2   : > { %2684 = vmatpush3.msra.mxu0 %v1797_v15  ;;  %2765 = vmatprep.subr.mxu1 %v1844_v26 }
  0xd3   : > { %2615 = vmatmul.mubr.msk.f32.gmra.mxu0 %vm439_vm1, %v1183_v28  ;;  %2631 = vmatmul.mubr.msk.f32.gmra.mxu1 %vm439_vm1, %v1183_v28 }
  0xd4   : > { %1406 = vmatprep.mubr.f32.mxu0 %v4341_v48  ;;  %1567 = vmatprep.mubr.f32.mxu1 %v4341_v48 }
  0xd5   : > { %2685 = vmatprep.subr.mxu0 %v1812_v22  ;;  %2766 = vmatpush3.msra.mxu1 %v1828_v25 }
  0xd6   : > { %2686 = vmatpush3.msra.mxu0 %v1796_v27  ;;  %2767 = vmatprep.subr.mxu1 %v1843_v33 }
  0xd7   : > { %2616 = vmatmul.mubr.msk.f32.gmra.mxu0 %vm439_vm1, %v1186_v45  ;;  %2632 = vmatmul.mubr.msk.f32.gmra.mxu1 %vm439_vm1, %v1186_v45  ;;  %v1810_v45 = vld [vmem:[%s4337_s3 + $0x80] sm:$0xff] }
  0xd8   : > { %1412 = vmatprep.mubr.f32.mxu0 %v4341_v48  ;;  %1573 = vmatprep.mubr.f32.mxu1 %v4341_v48 }
  0xd9   : > { %2687 = vmatprep.subr.mxu0 %v1811_v32  ;;  %2768 = vmatpush3.msra.mxu1 %v1827_v44 }
  0xda   : > { %2688 = vmatpush3.msra.mxu0 %v1795_v37  ;;  %2769 = vmatprep.subr.mxu1 %v1842_v50 }
  0xdb   : > { %2617 = vmatmul.mubr.msk.f32.gmra.mxu0 %vm439_vm1, %v1188_v54  ;;  %2633 = vmatmul.mubr.msk.f32.gmra.mxu1 %vm439_vm1, %v1188_v54 }
  0xdc   : > { %2689 = vmatprep.subr.mxu0 %v1810_v45  ;;  %2770 = vmatpush3.msra.mxu1 %v1826_v53 }
  0xdd   : > { %2690 = vmatpush3.msra.mxu0 %v1794_v52  ;;  %2837 = vmatprep.subr.mxu1 %v4341_v48 }
  0xde   : > { %2826 = vmatprep.subr.mxu0 %v4341_v48 }
  0xdf   : > { %v3732_v46 = vpop.f32.mrf.mxu0  ;;  %v3734_v47 = vpop.f32.mrf.mxu1 }
  0xe1   : > { %v3748_v2 = vpop.f32.mrf.mxu0  ;;  %v3750_v8 = vpop.f32.mrf.mxu1 }
  0xe3   : > { %v3764_v9 = vpop.f32.mrf.mxu0  ;;  %v3766_v21 = vpop.f32.mrf.mxu1 }
  0xe5   : > { %v3780_v43 = vpop.f32.mrf.mxu0  ;;  %v3782_v55 = vpop.f32.mrf.mxu1 }
  0xe7   : > { %v3796_v5 = vpop.f32.mrf.mxu0  ;;  %v3798_v14 = vpop.f32.mrf.mxu1 }
  0xe9   : > { %v3812_v17 = vpop.f32.mrf.mxu0  ;;  %v3814_v18 = vpop.f32.mrf.mxu1 }
  0xeb   : > { %v3828_v30 = vpop.f32.mrf.mxu0  ;;  %v3830_v28 = vpop.f32.mrf.mxu1 }
  0xed   : > { %v3844_v38 = vpop.f32.mrf.mxu0  ;;  %v3846_v39 = vpop.f32.mrf.mxu1 }
  0xef   : > { %v3860_v40 = vpop.f32.mrf.mxu0  ;;  %v3862_v51 = vpop.f32.mrf.mxu1 }
  0xf1   : > { %v3864_v54 = vpop.f32.mrf.mxu0  ;;  %v3866_v56 = vpop.f32.mrf.mxu1 }
  0xf3   : > { %v3870_v58 = vpop.f32.mrf.mxu0  ;;  %v3872_v59 = vpop.f32.mrf.mxu1 }
  0xf5   : > { %v3874_v60 = vpop.f32.mrf.mxu0  ;;  %v3876_v61 = vpop.f32.mrf.mxu1 }
  0xf6   : > { %4343 = vst [vmem:[#allocation2_spill] sm:$0xff] %v3874_v60  ;;  %4344 = vst [vmem:[#allocation3_spill] sm:$0xff] %v3876_v61 }
  0xf7   : > { %v3878_v62 = vpop.f32.mrf.mxu0  ;;  %v3880_v63 = vpop.f32.mrf.mxu1 }
  0xf9   : > { %v3882_v34 = vpop.f32.mrf.mxu0  ;;  %v3884_v35 = vpop.f32.mrf.mxu1 }
  0xfa   : > { %4345 = vst [vmem:[#allocation4_spill] sm:$0xff] %v3882_v34  ;;  %4346 = vst [vmem:[#allocation5_spill] sm:$0xff] %v3884_v35 }
  0xfb   : > { %v3886_v6 = vpop.f32.mrf.mxu0  ;;  %v3888_v31 = vpop.f32.mrf.mxu1 }
  0xfd   : > { %v3890_v36 = vpop.f32.mrf.mxu0  ;;  %v3892_v7 = vpop.f32.mrf.mxu1 }
  0xfe   : > { %4347 = vst [vmem:[#allocation6_spill] sm:$0xff] %v3890_v36  ;;  %4348 = vst [vmem:[#allocation7_spill] sm:$0xff] %v3892_v7 }
  0xff   : > { %v3894_v49 = vpop.f32.mrf.mxu0  ;;  %v3896_v57 = vpop.f32.mrf.mxu1 }
 0x101   : > { %v3898_v1 = vpop.f32.mrf.mxu0  ;;  %v3900_v3 = vpop.f32.mrf.mxu1 }
 0x102   : > { %4349 = vst [vmem:[#allocation8_spill] sm:$0xff] %v3898_v1  ;;  %4350 = vst [vmem:[#allocation9_spill] sm:$0xff] %v3900_v3 }
 0x103   : > { %v3902_v11 = vpop.f32.mrf.mxu0  ;;  %v3904_v19 = vpop.f32.mrf.mxu1 }
 0x105   : > { %v3906_v20 = vpop.f32.mrf.mxu0  ;;  %v3908_v29 = vpop.f32.mrf.mxu1 }
 0x106   : > { %4351 = vst [vmem:[#allocation10_spill] sm:$0xff] %v3906_v20  ;;  %4352 = vst [vmem:[#allocation11_spill] sm:$0xff] %v3908_v29 }
 0x107   : > { %v3910_v41 = vpop.f32.mrf.mxu0  ;;  %v3912_v42 = vpop.f32.mrf.mxu1 }
 0x109   : > { %v3914_v10 = vpop.f32.mrf.mxu0  ;;  %v3916_v0 = vpop.f32.mrf.mxu1 }
 0x10a   : > { %4353 = vst [vmem:[#allocation12_spill] sm:$0xff] %v3914_v10  ;;  %4354 = vst [vmem:[#allocation13_spill] sm:$0xff] %v3916_v0 }
 0x10b   : > { %v3918_v4 = vpop.f32.mrf.mxu0  ;;  %v3920_v12 = vpop.f32.mrf.mxu1 }
 0x10d   : > { %v3922_v13 = vpop.f32.mrf.mxu0  ;;  %v3924_v23 = vpop.f32.mrf.mxu1 }
 0x10e   : > { %4355 = vst [vmem:[#allocation14_spill] sm:$0xff] %v3922_v13  ;;  %4356 = vst [vmem:[#allocation15_spill] sm:$0xff] %v3924_v23 }
 0x10f   : > { %v3926_v24 = vpop.f32.mrf.mxu0  ;;  %v3928_v15 = vpop.f32.mrf.mxu1 }
 0x111   : > { %v3930_v16 = vpop.f32.mrf.mxu0  ;;  %v3932_v22 = vpop.f32.mrf.mxu1 }
 0x112   : > { %4357 = vst [vmem:[#allocation16_spill] sm:$0xff] %v3930_v16  ;;  %4358 = vst [vmem:[#allocation17_spill] sm:$0xff] %v3932_v22 }
 0x113   : > { %v3934_v26 = vpop.f32.mrf.mxu0  ;;  %v3936_v27 = vpop.f32.mrf.mxu1 }
 0x115   : > { %v3938_v25 = vpop.f32.mrf.mxu0  ;;  %v3940_v32 = vpop.f32.mrf.mxu1 }
 0x116   : > { %4359 = vst [vmem:[#allocation18_spill] sm:$0xff] %v3938_v25  ;;  %4360 = vst [vmem:[#allocation19_spill] sm:$0xff] %v3940_v32 }
 0x117   : > { %v3942_v33 = vpop.f32.mrf.mxu0  ;;  %v3944_v37 = vpop.f32.mrf.mxu1 }
 0x119   : > { %v3946_v44 = vpop.f32.mrf.mxu0  ;;  %v3948_v45 = vpop.f32.mrf.mxu1 }
 0x11a   : > { %4361 = vst [vmem:[#allocation20_spill] sm:$0xff] %v3946_v44  ;;  %4362 = vst [vmem:[#allocation21_spill] sm:$0xff] %v3948_v45 }
 0x11b   : > { %v3950_v50 = vpop.f32.mrf.mxu0  ;;  %v3952_v52 = vpop.f32.mrf.mxu1 }
 0x11d   : > { %v3954_v53 = vpop.f32.mrf.mxu0  ;;  %v3956_v48 = vpop.f32.mrf.mxu1 }
 0x11e   : > { %4363 = vst [vmem:[#allocation22_spill] sm:$0xff] %v3954_v53  ;;  %4364 = vst [vmem:[#allocation23_spill] sm:$0xff] %v3956_v48 }
 0x11f   : > { %v892_v22 = vpop.f32.mrf.mxu0  ;;  %v1053_v25 = vpop.f32.mrf.mxu1 }
 0x120   : > { %v3959_v32 = vadd.f32 %v892_v22, %v3732_v46  ;;  %v3962_v16 = vadd.f32 %v1053_v25, %v3734_v47 }
 0x121   : > { %v3964_v23 = vpop.f32.mrf.mxu0  ;;  %v3966_v44 = vpop.f32.mrf.mxu1 }
 0x123   : > { %v898_v45 = vpop.f32.mrf.mxu0  ;;  %v1059_v13 = vpop.f32.mrf.mxu1 }
 0x124   : > { %v3969_v0 = vadd.f32 %v898_v45, %v3764_v9  ;;  %v3972_v53 = vadd.f32 %v1059_v13, %v3766_v21 }
 0x125   : > { %v3974_v48 = vpop.f32.mrf.mxu0  ;;  %v3976_v10 = vpop.f32.mrf.mxu1 }
 0x127   : > { %v904_v46 = vpop.f32.mrf.mxu0  ;;  %v1065_v22 = vpop.f32.mrf.mxu1 }
 0x128   : > { %v3979_v47 = vadd.f32 %v904_v46, %v3796_v5  ;;  %v3982_v25 = vadd.f32 %v1065_v22, %v3798_v14 }
 0x129   : > { %v3984_v29 = vpop.f32.mrf.mxu0  ;;  %v3986_v20 = vpop.f32.mrf.mxu1 }
 0x12b   : > { %v910_v9 = vpop.f32.mrf.mxu0  ;;  %v1071_v45 = vpop.f32.mrf.mxu1 }
 0x12c   : > { %v3989_v21 = vadd.f32 %v910_v9, %v3828_v30  ;;  %v3992_v13 = vadd.f32 %v1071_v45, %v3830_v28 }
 0x12d   : > { %v3994_v3 = vpop.f32.mrf.mxu0  ;;  %v3996_v1 = vpop.f32.mrf.mxu1 }
 0x12f   : > { %v916_v5 = vpop.f32.mrf.mxu0  ;;  %v1077_v46 = vpop.f32.mrf.mxu1 }
 0x130   : > { %v3999_v14 = vadd.f32 %v916_v5, %v3860_v40  ;;  %v4002_v22 = vadd.f32 %v1077_v46, %v3862_v51 }
 0x131   : > { %v4004_v7 = vpop.f32.mrf.mxu0  ;;  %v4006_v36 = vpop.f32.mrf.mxu1 }
 0x133   : > { %v922_v30 = vpop.f32.mrf.mxu0  ;;  %v1083_v9 = vpop.f32.mrf.mxu1 }
 0x134   : > { %v4009_v28 = vadd.f32 %v922_v30, %v3870_v58  ;;  %v4012_v45 = vadd.f32 %v1083_v9, %v3872_v59 }
 0x135   : > { %v4014_v35 = vpop.f32.mrf.mxu0  ;;  %v4016_v34 = vpop.f32.mrf.mxu1 }
 0x136   : > { %4365 = vst [vmem:[#allocation24_spill] sm:$0xff] %v4012_v45  ;;  %4366 = vst [vmem:[#allocation25_spill] sm:$0xff] %v4016_v34 }
 0x137   : > { %v928_v40 = vpop.f32.mrf.mxu0  ;;  %v1089_v5 = vpop.f32.mrf.mxu1 }
 0x138   : > { %v4019_v51 = vadd.f32 %v928_v40, %v3878_v62  ;;  %v4022_v46 = vadd.f32 %v1089_v5, %v3880_v63 }
 0x139   : > { %v4024_v61 = vpop.f32.mrf.mxu0  ;;  %v4026_v60 = vpop.f32.mrf.mxu1 }
 0x13a   : > { %4367 = vst [vmem:[#allocation26_spill] sm:$0xff] %v4019_v51  ;;  %4368 = vst [vmem:[#allocation27_spill] sm:$0xff] %v4022_v46 }
 0x13b   : > { %v934_v58 = vpop.f32.mrf.mxu0  ;;  %v1095_v30 = vpop.f32.mrf.mxu1 }
 0x13c   : > { %v4029_v59 = vadd.f32 %v934_v58, %v3886_v6  ;;  %v4032_v9 = vadd.f32 %v1095_v30, %v3888_v31 }
 0x13d   : > { %v4034_v45 = vpop.f32.mrf.mxu0  ;;  %v4036_v34 = vpop.f32.mrf.mxu1 }
 0x13e   : > { %4369 = vst [vmem:[#allocation28_spill] sm:$0xff] %v4029_v59  ;;  %4370 = vst [vmem:[#allocation29_spill] sm:$0xff] %v4032_v9 }
 0x13f   : > { %v940_v62 = vpop.f32.mrf.mxu0  ;;  %v1101_v40 = vpop.f32.mrf.mxu1 }
 0x140   : > { %v4039_v63 = vadd.f32 %v940_v62, %v3894_v49  ;;  %v4042_v5 = vadd.f32 %v1101_v40, %v3896_v57 }
 0x141   : > { %v4044_v46 = vpop.f32.mrf.mxu0  ;;  %v4046_v51 = vpop.f32.mrf.mxu1 }
 0x142   : > { %4371 = vst [vmem:[#allocation30_spill] sm:$0xff] %v4042_v5  ;;  %4372 = vst [vmem:[#allocation31_spill] sm:$0xff] %v4046_v51 }
 0x143   : > { %v946_v6 = vpop.f32.mrf.mxu0  ;;  %v1107_v58 = vpop.f32.mrf.mxu1 }
 0x144   : > { %v4049_v31 = vadd.f32 %v946_v6, %v3902_v11  ;;  %v4052_v30 = vadd.f32 %v1107_v58, %v3904_v19 }
 0x145   : > { %v4054_v9 = vpop.f32.mrf.mxu0  ;;  %v4056_v59 = vpop.f32.mrf.mxu1 }
 0x146   : > { %4373 = vst [vmem:[#allocation32_spill] sm:$0xff] %v4049_v31  ;;  %4374 = vst [vmem:[#allocation33_spill] sm:$0xff] %v4052_v30 }
 0x147   : > { %v952_v49 = vpop.f32.mrf.mxu0  ;;  %v1113_v62 = vpop.f32.mrf.mxu1 }
 0x148   : > { %v4059_v57 = vadd.f32 %v952_v49, %v3910_v41  ;;  %v4062_v40 = vadd.f32 %v1113_v62, %v3912_v42 }
 0x149   : > { %v4064_v5 = vpop.f32.mrf.mxu0  ;;  %v4066_v51 = vpop.f32.mrf.mxu1 }
 0x14a   : > { %4375 = vst [vmem:[#allocation34_spill] sm:$0xff] %v4059_v57  ;;  %4376 = vst [vmem:[#allocation35_spill] sm:$0xff] %v4062_v40 }
 0x14b   : > { %v958_v11 = vpop.f32.mrf.mxu0  ;;  %v1119_v6 = vpop.f32.mrf.mxu1 }
 0x14c   : > { %v4069_v19 = vadd.f32 %v958_v11, %v3918_v4  ;;  %v4072_v58 = vadd.f32 %v1119_v6, %v3920_v12  ;;  %v1646_v12 = vlaneseq }
 0x14d   : > { %v4074_v30 = vpop.f32.mrf.mxu0  ;;  %v4076_v31 = vpop.f32.mrf.mxu1 }
 0x14e   : > { %4377 = vst [vmem:[#allocation36_spill] sm:$0xff] %v4072_v58  ;;  %4378 = vst [vmem:[#allocation37_spill] sm:$0xff] %v4076_v31 }
 0x14f   : > { %v964_v41 = vpop.f32.mrf.mxu0  ;;  %v1125_v49 = vpop.f32.mrf.mxu1 }
 0x150   : > { %v4079_v42 = vadd.f32 %v964_v41, %v3926_v24  ;;  %v4082_v62 = vadd.f32 %v1125_v49, %v3928_v15  ;;  %v1647_v49 = vshrl.u32 %v1646_v12, 7 }
 0x151   : > { %v4084_v40 = vpop.f32.mrf.mxu0  ;;  %v4086_v57 = vpop.f32.mrf.mxu1 }
 0x152   : > { %4379 = vst [vmem:[#allocation38_spill] sm:$0xff] %v4079_v42  ;;  %4380 = vst [vmem:[#allocation39_spill] sm:$0xff] %v4082_v62 }
 0x153   : > { %4381 = vst [vmem:[#allocation40_spill] sm:$0xff] %v4086_v57  ;;  %v970_v4 = vpop.f32.mrf.mxu0  ;;  %v1131_v11 = vpop.f32.mrf.mxu1 }
 0x154   : > { %v4089_v6 = vadd.f32 %v970_v4, %v3934_v26  ;;  %v4092_v58 = vadd.f32 %v1131_v11, %v3936_v27  ;;  %v1648_v11 = vsub.s32 0, %v1647_v49 }
 0x155   : > { %v4094_v31 = vpop.f32.mrf.mxu0  ;;  %v4096_v24 = vpop.f32.mrf.mxu1 }
 0x156   : > { %4382 = vst [vmem:[#allocation41_spill] sm:$0xff] %v4089_v6  ;;  %4383 = vst [vmem:[#allocation42_spill] sm:$0xff] %v4092_v58  ;;  %v1656_v58 = vsub.s32 2, %v1647_v49  ;;  %v1652_v6 = vsub.s32 1, %v1647_v49 }
 0x157   : > { %4384 = vst [vmem:[#allocation43_spill] sm:$0xff] %v4094_v31  ;;  %4385 = vst [vmem:[#allocation44_spill] sm:$0xff] %v4096_v24  ;;  %v976_v41 = vpop.f32.mrf.mxu0  ;;  %v1137_v15 = vpop.f32.mrf.mxu1  ;;  %v1660_v31 = vsub.s32 3, %v1647_v49 }
 0x158   : > { %v4099_v62 = vadd.f32 %v976_v41, %v3942_v33  ;;  %v4102_v42 = vadd.f32 %v1137_v15, %v3944_v37  ;;  %v1644_v33 = vld [vmem:[%s4336_s2] sm:$0xf] }
 0x159   : > { %v4104_v57 = vpop.f32.mrf.mxu0  ;;  %v4106_v26 = vpop.f32.mrf.mxu1  ;;  %v4125_v49 = vrot.slane %v1644_v33, %v1652_v6 }
 0x15a   : > { %4386 = vst [vmem:[#allocation45_spill] sm:$0xff] %v4102_v42  ;;  %4387 = vst [vmem:[#allocation46_spill] sm:$0xff] %v4104_v57  ;;  %v4121_v42 = vrot.slane %v1644_v33, %v1648_v11  ;;  %v4123_v57 = vrot.slane %v1644_v33, %v1656_v58 }
 0x15b   : > { %4388 = vst [vmem:[#allocation47_spill] sm:$0xff] %v4106_v26  ;;  %v982_v4 = vpop.f32.mrf.mxu0  ;;  %v1143_v27 = vpop.f32.mrf.mxu1 }
 0x15c   : > { %v4109_v24 = vadd.f32 %v982_v4, %v3950_v50  ;;  %v4112_v12 = vadd.f32 %v1143_v27, %v3952_v52  ;;  %v4127_v50 = vrot.slane %v1644_v33, %v1660_v31  ;;  %v895_v52 = vadd.f32 %v3964_v23, %v3748_v2 }
 0x15d   : > { %v4117_v37 = vpop.f32.mrf.mxu0  ;;  %v4119_v41 = vpop.f32.mrf.mxu1  ;;  %v1056_v4 = vadd.f32 %v3966_v44, %v3750_v8  ;;  %v901_v2 = vadd.f32 %v3974_v48, %v3780_v43  ;;  %v1062_v8 = vadd.f32 %v3976_v10, %v3782_v55 }
 0x15e   : > { %4389 = vst [vmem:[#allocation48_spill] sm:$0xff] %v4109_v24  ;;  %4390 = vst [vmem:[#allocation49_spill] sm:$0xff] %v4112_v12 }
 0x15f   : > { %4391 = vst [vmem:[#allocation50_spill] sm:$0xff] %v4117_v37  ;;  %4392 = vst [vmem:[#allocation51_spill] sm:$0xff] %v4119_v41  ;;  %v1324_v15 = vpop.f32.mrf.mxu0  ;;  %v1485_v26 = vpop.f32.mrf.mxu1 }
 0x160   : > { %v1580_v27 = vadd.f32 %v1324_v15, %v3959_v32  ;;  %v1582_v12 = vadd.f32 %v1485_v26, %v3962_v16 }
 0x161   : > { %v1326_v24 = vpop.f32.mrf.mxu0  ;;  %v1487_v11 = vpop.f32.mrf.mxu1 }
 0x162   : > { %v1581_v41 = vadd.f32 %v1326_v24, %v895_v52  ;;  %v1583_v37 = vadd.f32 %v1487_v11, %v1056_v4  ;;  %v1666_v58 = vadd.f32 %v4121_v42, %v1580_v27  ;;  %v1668_v6 = vadd.f32 %v4123_v57, %v1582_v12 }
 0x163   : > { %v1330_v31 = vpop.f32.mrf.mxu0  ;;  %v1491_v33 = vpop.f32.mrf.mxu1 }
 0x164   : > { %v1667_v23 = vadd.f32 %v4125_v49, %v1581_v41  ;;  %v1669_v16 = vadd.f32 %v4127_v50, %v1583_v37  ;;  %v1584_v32 = vadd.f32 %v1330_v31, %v3969_v0  ;;  %v1586_v44 = vadd.f32 %v1491_v33, %v3972_v53 }
 0x165   : > { %v1332_v24 = vpop.f32.mrf.mxu0  ;;  %v1493_v26 = vpop.f32.mrf.mxu1  ;;  %v1730_v27 = vmax.f32 %v1666_v58, 0.0  ;;  %v1732_v11 = vmax.f32 %v1668_v6, 0.0  ;;  %v907_v31 = vadd.f32 %v3984_v29, %v3812_v17  ;;  %v1068_v58 = vadd.f32 %v3986_v20, %v3814_v18 }
 0x166   : > { %v1731_v15 = vmax.f32 %v1667_v23, 0.0  ;;  %v1733_v12 = vmax.f32 %v1669_v16, 0.0  ;;  %v1585_v52 = vadd.f32 %v1332_v24, %v901_v2  ;;  %v1587_v4 = vadd.f32 %v1493_v26, %v1062_v8 }
 0x167   : > { %v1670_v48 = vadd.f32 %v4121_v42, %v1584_v32  ;;  %v1672_v43 = vadd.f32 %v4123_v57, %v1586_v44  ;;  %v1336_v55 = vpop.f32.mrf.mxu0  ;;  %v1497_v10 = vpop.f32.mrf.mxu1  ;;  %v913_v2 = vadd.f32 %v3994_v3, %v3844_v38  ;;  %v1074_v8 = vadd.f32 %v3996_v1, %v3846_v39 }
 0x168   : > { %v1671_v37 = vadd.f32 %v4125_v49, %v1585_v52  ;;  %v1673_v0 = vadd.f32 %v4127_v50, %v1587_v4  ;;  %v1588_v53 = vadd.f32 %v1336_v55, %v3979_v47  ;;  %v1590_v41 = vadd.f32 %v1497_v10, %v3982_v25  ;;  %1922 = vmatprep.mubr.f32.mxu0 %v1731_v15 }
 0x169   : > { %2067 = vmatprep.mubr.f32.mxu1 %v1733_v12  ;;  %v1338_v6 = vpop.f32.mrf.mxu0  ;;  %v1499_v33 = vpop.f32.mrf.mxu1  ;;  %1923 = vmatmul.mubr.f32.vlgmr.msra.gmra.mxu0 %v1730_v27  ;;  %v1734_v25 = vmax.f32 %v1670_v48, 0.0  ;;  %v1736_v20 = vmax.f32 %v1672_v43, 0.0  ;;  %v919_v15 = vadd.f32 %v4004_v7, %v3864_v54  ;;  %v1080_v12 = vadd.f32 %v4006_v36, %v3866_v56 }
 0x16a   : > { %v1735_v47 = vmax.f32 %v1671_v37, 0.0  ;;  %v1737_v23 = vmax.f32 %v1673_v0, 0.0  ;;  %2068 = vmatmul.mubr.f32.vlgmr.msra.gmra.mxu1 %v1732_v11  ;;  %v1674_v16 = vadd.f32 %v4121_v42, %v1588_v53  ;;  %v1589_v17 = vadd.f32 %v1338_v6, %v907_v31 }
 0x16b   : > { %v1591_v29 = vadd.f32 %v1499_v33, %v1068_v58  ;;  %v1342_v32 = vpop.f32.mrf.mxu0  ;;  %v1503_v18 = vpop.f32.mrf.mxu1  ;;  %v1676_v44 = vadd.f32 %v4123_v57, %v1590_v41 }
 0x16c   : > { %v1592_v24 = vadd.f32 %v1342_v32, %v3989_v21  ;;  %v1594_v38 = vadd.f32 %v1503_v18, %v3992_v13  ;;  %1927 = vmatprep.mubr.f32.mxu0 %v1735_v47  ;;  %2072 = vmatprep.mubr.f32.mxu1 %v1737_v23  ;;  %v1675_v39 = vadd.f32 %v4125_v49, %v1589_v17  ;;  %v1738_v55 = vmax.f32 %v1674_v16, 0.0  ;;  %v4393_v16 = vld [vmem:[#allocation2_spill] sm:$0xff]  ;;  %v4395_v32 = vld [vmem:[#allocation25_spill] sm:$0xff] }
 0x16d   : > { %v1677_v1 = vadd.f32 %v4127_v50, %v1591_v29  ;;  %v1344_v3 = vpop.f32.mrf.mxu0  ;;  %v1505_v26 = vpop.f32.mrf.mxu1  ;;  %1928 = vmatmul.mubr.f32.gmra.mxu0 %v1734_v25  ;;  %v1740_v10 = vmax.f32 %v1676_v44, 0.0  ;;  %v925_v17 = vadd.f32 %v4014_v35, %v4393_v16  ;;  %v4394_v29 = vld [vmem:[#allocation3_spill] sm:$0xff]  ;;  %v4404_v16 = vld [vmem:[#allocation29_spill] sm:$0xff] }
 0x16e   : > { %v1593_v52 = vadd.f32 %v1344_v3, %v913_v2  ;;  %v1595_v4 = vadd.f32 %v1505_v26, %v1074_v8  ;;  %2073 = vmatmul.mubr.f32.gmra.mxu1 %v1736_v20  ;;  %v1739_v21 = vmax.f32 %v1675_v39, 0.0  ;;  %v1678_v27 = vadd.f32 %v4121_v42, %v1592_v24  ;;  %v4396_v20 = vld [vmem:[#allocation24_spill] sm:$0xff] }
 0x16f   : > { %v1741_v13 = vmax.f32 %v1677_v1, 0.0  ;;  %v1680_v11 = vadd.f32 %v4123_v57, %v1594_v38  ;;  %v1348_v48 = vpop.f32.mrf.mxu0  ;;  %v1509_v43 = vpop.f32.mrf.mxu1  ;;  %v1086_v18 = vadd.f32 %v4395_v32, %v4394_v29  ;;  %v4397_v3 = vld [vmem:[#allocation4_spill] sm:$0xff] }
 0x170   : > { %v1679_v37 = vadd.f32 %v4125_v49, %v1593_v52  ;;  %v1681_v54 = vadd.f32 %v4127_v50, %v1595_v4  ;;  %v1596_v7 = vadd.f32 %v1348_v48, %v3999_v14  ;;  %v1598_v56 = vadd.f32 %v1509_v43, %v4002_v22  ;;  %1932 = vmatprep.mubr.f32.mxu0 %v1739_v21 }
 0x171   : > { %2077 = vmatprep.mubr.f32.mxu1 %v1741_v13  ;;  %v1350_v36 = vpop.f32.mrf.mxu0  ;;  %v1511_v0 = vpop.f32.mrf.mxu1  ;;  %1933 = vmatmul.mubr.f32.gmra.mxu0 %v1738_v55  ;;  %v1742_v6 = vmax.f32 %v1678_v27, 0.0  ;;  %v1744_v33 = vmax.f32 %v1680_v11, 0.0  ;;  %v931_v26 = vadd.f32 %v4024_v61, %v4397_v3  ;;  %v4399_v11 = vld [vmem:[#allocation26_spill] sm:$0xff] }
 0x172   : > { %v1743_v53 = vmax.f32 %v1679_v37, 0.0  ;;  %v1745_v41 = vmax.f32 %v1681_v54, 0.0  ;;  %v1597_v31 = vadd.f32 %v1350_v36, %v919_v15  ;;  %v1599_v58 = vadd.f32 %v1511_v0, %v1080_v12  ;;  %2078 = vmatmul.mubr.f32.gmra.mxu1 %v1740_v10  ;;  %v4400_v10 = vld [vmem:[#allocation27_spill] sm:$0xff]  ;;  %v4401_v36 = vld [vmem:[#allocation6_spill] sm:$0xff] }
 0x173   : > { %v1682_v2 = vadd.f32 %v4121_v42, %v1596_v7  ;;  %v1354_v8 = vpop.f32.mrf.mxu0  ;;  %v1515_v47 = vpop.f32.mrf.mxu1  ;;  %v1684_v14 = vadd.f32 %v4123_v57, %v1598_v56  ;;  %v937_v0 = vadd.f32 %v4034_v45, %v4401_v36 }
 0x174   : > { %v1683_v22 = vadd.f32 %v4125_v49, %v1597_v31  ;;  %v1685_v23 = vadd.f32 %v4127_v50, %v1599_v58  ;;  %v1600_v25 = vadd.f32 %v1354_v8, %v4009_v28  ;;  %1937 = vmatprep.mubr.f32.mxu0 %v1743_v53  ;;  %v1602_v44 = vadd.f32 %v1515_v47, %v4396_v20  ;;  %v4398_v28 = vld [vmem:[#allocation5_spill] sm:$0xff] }
 0x175   : > { %2082 = vmatprep.mubr.f32.mxu1 %v1745_v41  ;;  %v1356_v24 = vpop.f32.mrf.mxu0  ;;  %v1517_v38 = vpop.f32.mrf.mxu1  ;;  %1938 = vmatmul.mubr.f32.gmra.mxu0 %v1742_v6  ;;  %v1092_v15 = vadd.f32 %v4026_v60, %v4398_v28  ;;  %v1746_v21 = vmax.f32 %v1682_v2, 0.0  ;;  %v1748_v13 = vmax.f32 %v1684_v14, 0.0 }
 0x176   : > { %v1747_v39 = vmax.f32 %v1683_v22, 0.0  ;;  %v1749_v1 = vmax.f32 %v1685_v23, 0.0  ;;  %2083 = vmatmul.mubr.f32.gmra.mxu1 %v1744_v33  ;;  %v1601_v12 = vadd.f32 %v1356_v24, %v925_v17  ;;  %v1603_v35 = vadd.f32 %v1517_v38, %v1086_v18  ;;  %v4402_v33 = vld [vmem:[#allocation7_spill] sm:$0xff] }
 0x177   : > { %v1360_v52 = vpop.f32.mrf.mxu0  ;;  %v1521_v4 = vpop.f32.mrf.mxu1  ;;  %v1686_v27 = vadd.f32 %v4121_v42, %v1600_v25  ;;  %v1688_v43 = vadd.f32 %v4123_v57, %v1602_v44  ;;  %v1098_v2 = vadd.f32 %v4036_v34, %v4402_v33  ;;  %v4403_v25 = vld [vmem:[#allocation28_spill] sm:$0xff] }
 0x178   : > { %v1604_v48 = vadd.f32 %v1360_v52, %v4399_v11  ;;  %1942 = vmatprep.mubr.f32.mxu0 %v1747_v39  ;;  %2087 = vmatprep.mubr.f32.mxu1 %v1749_v1  ;;  %v1687_v55 = vadd.f32 %v4125_v49, %v1601_v12  ;;  %v1689_v61 = vadd.f32 %v4127_v50, %v1603_v35  ;;  %v4405_v12 = vld [vmem:[#allocation8_spill] sm:$0xff]  ;;  %v4406_v52 = vld [vmem:[#allocation9_spill] sm:$0xff] }
 0x179   : > { %v1606_v60 = vadd.f32 %v1521_v4, %v4400_v10  ;;  %v1362_v37 = vpop.f32.mrf.mxu0  ;;  %v1523_v54 = vpop.f32.mrf.mxu1  ;;  %1943 = vmatmul.mubr.f32.gmra.mxu0 %v1746_v21  ;;  %v1750_v8 = vmax.f32 %v1686_v27, 0.0  ;;  %v1752_v22 = vmax.f32 %v1688_v43, 0.0  ;;  %v943_v35 = vadd.f32 %v4044_v46, %v4405_v12  ;;  %v4407_v4 = vld [vmem:[#allocation31_spill] sm:$0xff]  ;;  %v4408_v27 = vld [vmem:[#allocation30_spill] sm:$0xff] }
 0x17a   : > { %v1605_v7 = vadd.f32 %v1362_v37, %v931_v26  ;;  %v1607_v56 = vadd.f32 %v1523_v54, %v1092_v15  ;;  %v1751_v53 = vmax.f32 %v1687_v55, 0.0  ;;  %v1753_v41 = vmax.f32 %v1689_v61, 0.0  ;;  %2088 = vmatmul.mubr.f32.gmra.mxu1 %v1748_v13  ;;  %v4409_v10 = vld [vmem:[#allocation10_spill] sm:$0xff] }
 0x17b   : > { %v1690_v31 = vadd.f32 %v4121_v42, %v1604_v48  ;;  %v1366_v58 = vpop.f32.mrf.mxu0  ;;  %v1527_v6 = vpop.f32.mrf.mxu1  ;;  %v1692_v23 = vadd.f32 %v4123_v57, %v1606_v60  ;;  %v1104_v21 = vadd.f32 %v4407_v4, %v4406_v52  ;;  %v949_v60 = vadd.f32 %v4054_v9, %v4409_v10  ;;  %v4418_v10 = vld [vmem:[#allocation15_spill] sm:$0xff] }
 0x17c   : > { %v1691_v47 = vadd.f32 %v4125_v49, %v1605_v7  ;;  %v1693_v14 = vadd.f32 %v4127_v50, %v1607_v56  ;;  %v1608_v45 = vadd.f32 %v1366_v58, %v4403_v25  ;;  %v1610_v17 = vadd.f32 %v1527_v6, %v4404_v16  ;;  %1947 = vmatprep.mubr.f32.mxu0 %v1751_v53 }
 0x17d   : > { %2092 = vmatprep.mubr.f32.mxu1 %v1753_v41  ;;  %v1368_v29 = vpop.f32.mrf.mxu0  ;;  %v1529_v32 = vpop.f32.mrf.mxu1  ;;  %1948 = vmatmul.mubr.f32.gmra.mxu0 %v1750_v8  ;;  %v1754_v24 = vmax.f32 %v1690_v31, 0.0  ;;  %v1756_v13 = vmax.f32 %v1692_v23, 0.0  ;;  %v4411_v41 = vld [vmem:[#allocation32_spill] sm:$0xff] }
 0x17e   : > { %v1755_v18 = vmax.f32 %v1691_v47, 0.0  ;;  %v1757_v20 = vmax.f32 %v1693_v14, 0.0  ;;  %v1609_v44 = vadd.f32 %v1368_v29, %v937_v0  ;;  %v1611_v34 = vadd.f32 %v1529_v32, %v1098_v2  ;;  %2093 = vmatmul.mubr.f32.gmra.mxu1 %v1752_v22  ;;  %v4413_v22 = vld [vmem:[#allocation12_spill] sm:$0xff]  ;;  %v4414_v32 = vld [vmem:[#allocation13_spill] sm:$0xff] }
 0x17f   : > { %v1694_v38 = vadd.f32 %v4121_v42, %v1608_v45  ;;  %v1372_v39 = vpop.f32.mrf.mxu0  ;;  %v1533_v1 = vpop.f32.mrf.mxu1  ;;  %v1696_v3 = vadd.f32 %v4123_v57, %v1610_v17  ;;  %v955_v23 = vadd.f32 %v4064_v5, %v4413_v22 }
 0x180   : > { %v1695_v26 = vadd.f32 %v4125_v49, %v1609_v44  ;;  %v1697_v28 = vadd.f32 %v4127_v50, %v1611_v34  ;;  %v1612_v15 = vadd.f32 %v1372_v39, %v4039_v63  ;;  %1952 = vmatprep.mubr.f32.mxu0 %v1755_v18  ;;  %v1614_v11 = vadd.f32 %v1533_v1, %v4408_v27  ;;  %v4410_v63 = vld [vmem:[#allocation11_spill] sm:$0xff]  ;;  %v4415_v39 = vld [vmem:[#allocation34_spill] sm:$0xff] }
 0x181   : > { %2097 = vmatprep.mubr.f32.mxu1 %v1757_v20  ;;  %v1374_v48 = vpop.f32.mrf.mxu0  ;;  %v1535_v43 = vpop.f32.mrf.mxu1  ;;  %1953 = vmatmul.mubr.f32.gmra.mxu0 %v1754_v24  ;;  %v1110_v37 = vadd.f32 %v4056_v59, %v4410_v63  ;;  %v1758_v36 = vmax.f32 %v1694_v38, 0.0  ;;  %v1760_v0 = vmax.f32 %v1696_v3, 0.0  ;;  %v4412_v59 = vld [vmem:[#allocation33_spill] sm:$0xff]  ;;  %v1116_v18 = vadd.f32 %v4066_v51, %v4414_v32  ;;  %v4416_v1 = vld [vmem:[#allocation35_spill] sm:$0xff] }
 0x182   : > { %v1759_v55 = vmax.f32 %v1695_v26, 0.0  ;;  %v1761_v61 = vmax.f32 %v1697_v28, 0.0  ;;  %v1613_v54 = vadd.f32 %v1374_v48, %v943_v35  ;;  %v1615_v46 = vadd.f32 %v1535_v43, %v1104_v21  ;;  %2098 = vmatmul.mubr.f32.gmra.mxu1 %v1756_v13 }
 0x183   : > { %v1378_v7 = vpop.f32.mrf.mxu0  ;;  %v1539_v56 = vpop.f32.mrf.mxu1  ;;  %v1698_v53 = vadd.f32 %v4121_v42, %v1612_v15  ;;  %v1700_v58 = vadd.f32 %v4123_v57, %v1614_v11 }
 0x184   : > { %v1616_v31 = vadd.f32 %v1378_v7, %v4411_v41  ;;  %1957 = vmatprep.mubr.f32.mxu0 %v1759_v55  ;;  %2102 = vmatprep.mubr.f32.mxu1 %v1761_v61  ;;  %v1699_v9 = vadd.f32 %v4125_v49, %v1613_v54  ;;  %v1701_v6 = vadd.f32 %v4127_v50, %v1615_v46  ;;  %v4417_v55 = vld [vmem:[#allocation14_spill] sm:$0xff]  ;;  %v4420_v54 = vld [vmem:[#allocation36_spill] sm:$0xff] }
 0x185   : > { %v1618_v33 = vadd.f32 %v1539_v56, %v4412_v59  ;;  %v1380_v2 = vpop.f32.mrf.mxu0  ;;  %v1541_v8 = vpop.f32.mrf.mxu1  ;;  %1958 = vmatmul.mubr.f32.gmra.mxu0 %v1758_v36  ;;  %v1762_v20 = vmax.f32 %v1698_v53, 0.0  ;;  %v1764_v24 = vmax.f32 %v1700_v58, 0.0  ;;  %v961_v61 = vadd.f32 %v4074_v30, %v4417_v55  ;;  %v4421_v53 = vld [vmem:[#allocation16_spill] sm:$0xff] }
 0x186   : > { %v1617_v47 = vadd.f32 %v1380_v2, %v949_v60  ;;  %v1619_v14 = vadd.f32 %v1541_v8, %v1110_v37  ;;  %v1763_v25 = vmax.f32 %v1699_v9, 0.0  ;;  %v1765_v45 = vmax.f32 %v1701_v6, 0.0  ;;  %2103 = vmatmul.mubr.f32.gmra.mxu1 %v1760_v0  ;;  %v4419_v60 = vld [vmem:[#allocation37_spill] sm:$0xff] }
 0x187   : > { %v1702_v16 = vadd.f32 %v4121_v42, %v1616_v31  ;;  %v1384_v17 = vpop.f32.mrf.mxu0  ;;  %v1545_v29 = vpop.f32.mrf.mxu1  ;;  %v1704_v38 = vadd.f32 %v4123_v57, %v1618_v33  ;;  %v1122_v63 = vadd.f32 %v4419_v60, %v4418_v10  ;;  %v967_v41 = vadd.f32 %v4084_v40, %v4421_v53  ;;  %v4423_v31 = vld [vmem:[#allocation40_spill] sm:$0xff] }
 0x188   : > { %v1703_v44 = vadd.f32 %v4125_v49, %v1617_v47  ;;  %v1705_v34 = vadd.f32 %v4127_v50, %v1619_v14  ;;  %v1620_v5 = vadd.f32 %v1384_v17, %v4415_v39  ;;  %v1622_v3 = vadd.f32 %v1545_v29, %v4416_v1  ;;  %1962 = vmatprep.mubr.f32.mxu0 %v1763_v25  ;;  %v4424_v47 = vld [vmem:[#allocation38_spill] sm:$0xff]  ;;  %v4425_v25 = vld [vmem:[#allocation39_spill] sm:$0xff] }
 0x189   : > { %2107 = vmatprep.mubr.f32.mxu1 %v1765_v45  ;;  %v1386_v26 = vpop.f32.mrf.mxu0  ;;  %v1547_v28 = vpop.f32.mrf.mxu1  ;;  %1963 = vmatmul.mubr.f32.gmra.mxu0 %v1762_v20  ;;  %v1766_v52 = vmax.f32 %v1702_v16, 0.0  ;;  %v1768_v37 = vmax.f32 %v1704_v38, 0.0  ;;  %v4427_v20 = vld [vmem:[#allocation43_spill] sm:$0xff] }
 0x18a   : > { %v1767_v15 = vmax.f32 %v1703_v44, 0.0  ;;  %v1769_v12 = vmax.f32 %v1705_v34, 0.0  ;;  %v1621_v35 = vadd.f32 %v1386_v26, %v955_v23  ;;  %v1623_v51 = vadd.f32 %v1547_v28, %v1116_v18  ;;  %2108 = vmatmul.mubr.f32.gmra.mxu1 %v1764_v24  ;;  %v4426_v18 = vld [vmem:[#allocation18_spill] sm:$0xff]  ;;  %v4428_v1 = vld [vmem:[#allocation19_spill] sm:$0xff] }
 0x18b   : > { %v1706_v4 = vadd.f32 %v4121_v42, %v1620_v5  ;;  %v1390_v21 = vpop.f32.mrf.mxu0  ;;  %v1551_v13 = vpop.f32.mrf.mxu1  ;;  %v1708_v27 = vadd.f32 %v4123_v57, %v1622_v3  ;;  %v973_v44 = vadd.f32 %v4427_v20, %v4426_v18  ;;  %v4429_v3 = vld [vmem:[#allocation44_spill] sm:$0xff] }
 0x18c   : > { %v1707_v11 = vadd.f32 %v4125_v49, %v1621_v35  ;;  %v1709_v48 = vadd.f32 %v4127_v50, %v1623_v51  ;;  %v1624_v43 = vadd.f32 %v1390_v21, %v4069_v19  ;;  %1967 = vmatprep.mubr.f32.mxu0 %v1767_v15  ;;  %v1626_v46 = vadd.f32 %v1551_v13, %v4420_v54  ;;  %v4422_v19 = vld [vmem:[#allocation17_spill] sm:$0xff]  ;;  %v4431_v21 = vld [vmem:[#allocation42_spill] sm:$0xff]  ;;  %v4441_v18 = vld [vmem:[#allocation48_spill] sm:$0xff] }
 0x18d   : > { %2112 = vmatprep.mubr.f32.mxu1 %v1769_v12  ;;  %v1392_v7 = vpop.f32.mrf.mxu0  ;;  %v1553_v56 = vpop.f32.mrf.mxu1  ;;  %1968 = vmatmul.mubr.f32.gmra.mxu0 %v1766_v52  ;;  %v1128_v58 = vadd.f32 %v4423_v31, %v4422_v19  ;;  %v1770_v33 = vmax.f32 %v1706_v4, 0.0  ;;  %v1772_v2 = vmax.f32 %v1708_v27, 0.0  ;;  %v1134_v26 = vadd.f32 %v4429_v3, %v4428_v1  ;;  %v4430_v52 = vld [vmem:[#allocation41_spill] sm:$0xff]  ;;  %v4435_v19 = vld [vmem:[#allocation47_spill] sm:$0xff] }
 0x18e   : > { %v1771_v36 = vmax.f32 %v1707_v11, 0.0  ;;  %v1773_v0 = vmax.f32 %v1709_v48, 0.0  ;;  %v1625_v9 = vadd.f32 %v1392_v7, %v961_v61  ;;  %v1627_v30 = vadd.f32 %v1553_v56, %v1122_v63  ;;  %2113 = vmatmul.mubr.f32.gmra.mxu1 %v1768_v37 }
 0x18f   : > { %v1396_v6 = vpop.f32.mrf.mxu0  ;;  %v1557_v59 = vpop.f32.mrf.mxu1  ;;  %v1710_v8 = vadd.f32 %v4121_v42, %v1624_v43  ;;  %v1712_v22 = vadd.f32 %v4123_v57, %v1626_v46 }
 0x190   : > { %v1628_v14 = vadd.f32 %v1396_v6, %v4424_v47  ;;  %1972 = vmatprep.mubr.f32.mxu0 %v1771_v36  ;;  %2117 = vmatprep.mubr.f32.mxu1 %v1773_v0  ;;  %v1711_v40 = vadd.f32 %v4125_v49, %v1625_v9  ;;  %v1713_v23 = vadd.f32 %v4127_v50, %v1627_v30  ;;  %v4432_v36 = vld [vmem:[#allocation20_spill] sm:$0xff]  ;;  %v4433_v0 = vld [vmem:[#allocation46_spill] sm:$0xff]  ;;  %v4436_v9 = vld [vmem:[#allocation45_spill] sm:$0xff] }
 0x191   : > { %v1630_v45 = vadd.f32 %v1557_v59, %v4425_v25  ;;  %v1398_v16 = vpop.f32.mrf.mxu0  ;;  %v1559_v17 = vpop.f32.mrf.mxu1  ;;  %1973 = vmatmul.mubr.f32.gmra.mxu0 %v1770_v33  ;;  %v1774_v28 = vmax.f32 %v1710_v8, 0.0  ;;  %v1776_v35 = vmax.f32 %v1712_v22, 0.0  ;;  %v979_v53 = vadd.f32 %v4433_v0, %v4432_v36  ;;  %v4437_v8 = vld [vmem:[#allocation22_spill] sm:$0xff]  ;;  %v4440_v22 = vld [vmem:[#allocation51_spill] sm:$0xff] }
 0x192   : > { %v1629_v29 = vadd.f32 %v1398_v16, %v967_v41  ;;  %v1631_v32 = vadd.f32 %v1559_v17, %v1128_v58  ;;  %v1775_v34 = vmax.f32 %v1711_v40, 0.0  ;;  %v1777_v24 = vmax.f32 %v1713_v23, 0.0  ;;  %2118 = vmatmul.mubr.f32.gmra.mxu1 %v1772_v2  ;;  %v4434_v41 = vld [vmem:[#allocation21_spill] sm:$0xff]  ;;  %v4438_v47 = vld [vmem:[#allocation50_spill] sm:$0xff] }
 0x193   : > { %v1714_v38 = vadd.f32 %v4121_v42, %v1628_v14  ;;  %v1402_v39 = vpop.f32.mrf.mxu0  ;;  %v1563_v5 = vpop.f32.mrf.mxu1  ;;  %v1716_v51 = vadd.f32 %v4123_v57, %v1630_v45  ;;  %v1140_v31 = vadd.f32 %v4435_v19, %v4434_v41  ;;  %v985_v14 = vadd.f32 %v4438_v47, %v4437_v8 }
 0x194   : > { %v1715_v15 = vadd.f32 %v4125_v49, %v1629_v29  ;;  %v1717_v12 = vadd.f32 %v4127_v50, %v1631_v32  ;;  %v1632_v4 = vadd.f32 %v1402_v39, %v4430_v52  ;;  %v1634_v13 = vadd.f32 %v1563_v5, %v4431_v21  ;;  %1977 = vmatprep.mubr.f32.mxu0 %v1775_v34 }
 0x195   : > { %2122 = vmatprep.mubr.f32.mxu1 %v1777_v24  ;;  %v1404_v27 = vpop.f32.mrf.mxu0  ;;  %v1565_v11 = vpop.f32.mrf.mxu1  ;;  %1978 = vmatmul.mubr.f32.gmra.mxu0 %v1774_v28  ;;  %v1778_v10 = vmax.f32 %v1714_v38, 0.0  ;;  %v1780_v58 = vmax.f32 %v1716_v51, 0.0  ;;  %v4442_v38 = vld [vmem:[#allocation49_spill] sm:$0xff] }
 0x196   : > { %v1779_v48 = vmax.f32 %v1715_v15, 0.0  ;;  %v1781_v43 = vmax.f32 %v1717_v12, 0.0  ;;  %v1633_v55 = vadd.f32 %v1404_v27, %v973_v44  ;;  %v1635_v61 = vadd.f32 %v1565_v11, %v1134_v26  ;;  %2123 = vmatmul.mubr.f32.gmra.mxu1 %v1776_v35 }
 0x197   : > { %v1718_v60 = vadd.f32 %v4121_v42, %v1632_v4  ;;  %v1408_v63 = vpop.f32.mrf.mxu0  ;;  %v1569_v37 = vpop.f32.mrf.mxu1  ;;  %v1720_v54 = vadd.f32 %v4123_v57, %v1634_v13 }
 0x198   : > { %v1719_v46 = vadd.f32 %v4125_v49, %v1633_v55  ;;  %v1721_v7 = vadd.f32 %v4127_v50, %v1635_v61  ;;  %v1636_v56 = vadd.f32 %v1408_v63, %v4099_v62  ;;  %1982 = vmatprep.mubr.f32.mxu0 %v1779_v48  ;;  %v1638_v30 = vadd.f32 %v1569_v37, %v4436_v9  ;;  %v4439_v62 = vld [vmem:[#allocation23_spill] sm:$0xff] }
 0x199   : > { %2127 = vmatprep.mubr.f32.mxu1 %v1781_v43  ;;  %v1410_v6 = vpop.f32.mrf.mxu0  ;;  %v1571_v59 = vpop.f32.mrf.mxu1  ;;  %1983 = vmatmul.mubr.f32.gmra.mxu0 %v1778_v10  ;;  %v1146_v40 = vadd.f32 %v4440_v22, %v4439_v62  ;;  %v1782_v17 = vmax.f32 %v1718_v60, 0.0  ;;  %v1784_v29 = vmax.f32 %v1720_v54, 0.0  ;;  %v2221_v43 = vld [vmem:[%s4338_s4] sm:$0xff] }
 0x19a   : > { %v1783_v33 = vmax.f32 %v1719_v46, 0.0  ;;  %v1785_v2 = vmax.f32 %v1721_v7, 0.0  ;;  %v1637_v23 = vadd.f32 %v1410_v6, %v979_v53  ;;  %v1639_v25 = vadd.f32 %v1571_v59, %v1140_v31  ;;  %2128 = vmatmul.mubr.f32.gmra.mxu1 %v1780_v58 }
 0x19b   : > { %v1414_v45 = vpop.f32.mrf.mxu0  ;;  %v1575_v16 = vpop.f32.mrf.mxu1  ;;  %v1722_v32 = vadd.f32 %v4121_v42, %v1636_v56  ;;  %v1724_v44 = vadd.f32 %v4123_v57, %v1638_v30 }
 0x19c   : > { %v1640_v20 = vadd.f32 %v1414_v45, %v4441_v18  ;;  %1987 = vmatprep.mubr.f32.mxu0 %v1783_v33  ;;  %2132 = vmatprep.mubr.f32.mxu1 %v1785_v2  ;;  %v1723_v34 = vadd.f32 %v4125_v49, %v1637_v23  ;;  %v1725_v24 = vadd.f32 %v4127_v50, %v1639_v25 }
 0x19d   : > { %v1642_v39 = vadd.f32 %v1575_v16, %v4442_v38  ;;  %v1416_v5 = vpop.f32.mrf.mxu0  ;;  %v1577_v1 = vpop.f32.mrf.mxu1  ;;  %1988 = vmatmul.mubr.f32.gmra.mxu0 %v1782_v17  ;;  %v1786_v12 = vmax.f32 %v1722_v32, 0.0  ;;  %v1788_v4 = vmax.f32 %v1724_v44, 0.0 }
 0x19e   : > { %v1641_v3 = vadd.f32 %v1416_v5, %v985_v14  ;;  %v1643_v26 = vadd.f32 %v1577_v1, %v1146_v40  ;;  %v1787_v28 = vmax.f32 %v1723_v34, 0.0  ;;  %v1789_v15 = vmax.f32 %v1725_v24, 0.0  ;;  %2133 = vmatmul.mubr.f32.gmra.mxu1 %v1784_v29 }
 0x19f   : > { %v1726_v35 = vadd.f32 %v4121_v42, %v1640_v20  ;;  %v1728_v21 = vadd.f32 %v4123_v57, %v1642_v39  ;;  %v2224_v42 = vld [vmem:[%s4338_s4 + $0x18] sm:$0xff]  ;;  %v2223_v57 = vld [vmem:[%s4338_s4 + $0x10] sm:$0xff] }
 0x1a0   : > { %v1727_v51 = vadd.f32 %v4125_v49, %v1641_v3  ;;  %v1729_v52 = vadd.f32 %v4127_v50, %v1643_v26  ;;  %1992 = vmatprep.mubr.f32.mxu0 %v1787_v28  ;;  %2137 = vmatprep.mubr.f32.mxu1 %v1789_v15  ;;  %v4443_v49 = vmov 0.0   ;;  %v2222_v50 = vld [vmem:[%s4338_s4 + $0x8] sm:$0xff] }
 0x1a1   : > { %1993 = vmatmul.mubr.f32.gmra.mxu0 %v1786_v12  ;;  %v1790_v11 = vmax.f32 %v1726_v35, 0.0  ;;  %v1792_v48 = vmax.f32 %v1728_v21, 0.0 }
 0x1a2   : > { %v1791_v13 = vmax.f32 %v1727_v51, 0.0  ;;  %v1793_v27 = vmax.f32 %v1729_v52, 0.0  ;;  %2138 = vmatmul.mubr.f32.gmra.mxu1 %v1788_v4  ;;  %2827 = vmatpush3.msra.mxu0 %v2224_v42 }
 0x1a3   : > { %2828 = vmatprep.subr.mxu0 %v4443_v49 }
 0x1a4   : > { %1997 = vmatprep.mubr.f32.mxu0 %v1791_v13  ;;  %2142 = vmatprep.mubr.f32.mxu1 %v1793_v27 }
 0x1a5   : > { %1998 = vmatmul.mubr.f32.gmra.mxu0 %v1790_v11 }
 0x1a6   : > { %2143 = vmatmul.mubr.f32.gmra.mxu1 %v1792_v48  ;;  %2829 = vmatpush3.msra.mxu0 %v2223_v57 }
 0x1a7   : > { %2830 = vmatprep.subr.mxu0 %v4443_v49  ;;  %2834 = vmatprep.mubr.msk.f32.mxu0 %vm2867_vm3, %v4443_v49 }
 0x1a8   : > { %2831 = vmatpush3.msra.mxu0 %v2222_v50  ;;  %2839 = vmatprep.mubr.msk.f32.mxu1 %vm2867_vm3, %v4443_v49 }
 0x1a9   : > { %2832 = vmatprep.subr.mxu0 %v4443_v49 }
 0x1aa   : > { %2833 = vmatpush3.msra.mxu0 %v2221_v43 }
 0x229   : > { %v2691_v55 = vpop.f32.mrf.mxu0 }
 0x22a   : > { %v2771_v61 = vpop.f32.mrf.mxu1 }
 0x22b   : > { %v2692_v10 = vpop.f32.mrf.mxu0 }
 0x22c   : > { %v2772_v60 = vpop.f32.mrf.mxu1  ;;  %v2693_v24 = vadd.f32 %v2692_v10, %v2691_v55 }
 0x22d   : > { %v2694_v63 = vpop.f32.mrf.mxu0  ;;  %v2773_v21 = vadd.f32 %v2772_v60, %v2771_v61 }
 0x22e   : > { %v2774_v37 = vpop.f32.mrf.mxu1 }
 0x22f   : > { %v2695_v54 = vpop.f32.mrf.mxu0 }
 0x230   : > { %v2775_v46 = vpop.f32.mrf.mxu1  ;;  %v2696_v38 = vadd.f32 %v2695_v54, %v2694_v63 }
 0x231   : > { %v2697_v7 = vpop.f32.mrf.mxu0  ;;  %v2776_v39 = vadd.f32 %v2775_v46, %v2774_v37 }
 0x232   : > { %v2777_v56 = vpop.f32.mrf.mxu1 }
 0x233   : > { %v2698_v36 = vpop.f32.mrf.mxu0  ;;  %v2075_v55 = vadd.f32 %v2776_v39, %v2696_v38 }
 0x234   : > { %v2778_v0 = vpop.f32.mrf.mxu1  ;;  %v2699_v1 = vadd.f32 %v2698_v36, %v2697_v7 }
 0x235   : > { %v2700_v53 = vpop.f32.mrf.mxu0  ;;  %v2779_v3 = vadd.f32 %v2778_v0, %v2777_v56  ;;  %v2070_v0 = vadd.f32 %v2773_v21, %v2693_v24 }
 0x236   : > { %v2780_v41 = vpop.f32.mrf.mxu1 }
 0x237   : > { %v2701_v19 = vpop.f32.mrf.mxu0  ;;  %v2080_v10 = vadd.f32 %v2779_v3, %v2699_v1 }
 0x238   : > { %v2781_v31 = vpop.f32.mrf.mxu1  ;;  %v2702_v20 = vadd.f32 %v2701_v19, %v2700_v53 }
 0x239   : > { %v2703_v58 = vpop.f32.mrf.mxu0  ;;  %v2782_v44 = vadd.f32 %v2781_v31, %v2780_v41 }
 0x23a   : > { %v2783_v9 = vpop.f32.mrf.mxu1 }
 0x23b   : > { %v2704_v30 = vpop.f32.mrf.mxu0  ;;  %v2085_v13 = vadd.f32 %v2782_v44, %v2702_v20 }
 0x23c   : > { %v2784_v6 = vpop.f32.mrf.mxu1  ;;  %v2705_v27 = vadd.f32 %v2704_v30, %v2703_v58  ;;  %v2150_v58 = vsel %vm2148_vm4, %v2075_v55, 0.0 }
 0x23d   : > { %v2706_v59 = vpop.f32.mrf.mxu0  ;;  %v2785_v11 = vadd.f32 %v2784_v6, %v2783_v9  ;;  %v2159_v53 = vsel %vm2148_vm4, %v2085_v13, 0.0  ;;  %v2158_v9 = vsel %vm2148_vm4, %v2080_v10, 0.0 }
 0x23e   : > { %v2786_v33 = vpop.f32.mrf.mxu1 }
 0x23f   : > { %v2707_v2 = vpop.f32.mrf.mxu0  ;;  %v2090_v61 = vadd.f32 %v2785_v11, %v2705_v27 }
 0x240   : > { %v2787_v8 = vpop.f32.mrf.mxu1  ;;  %v2708_v26 = vadd.f32 %v2707_v2, %v2706_v59 }
 0x241   : > { %v2709_v47 = vpop.f32.mrf.mxu0  ;;  %v2788_v28 = vadd.f32 %v2787_v8, %v2786_v33 }
 0x242   : > { %v2789_v14 = vpop.f32.mrf.mxu1 }
 0x243   : > { %v2710_v62 = vpop.f32.mrf.mxu0  ;;  %v2095_v63 = vadd.f32 %v2788_v28, %v2708_v26 }
 0x244   : > { %v2790_v22 = vpop.f32.mrf.mxu1  ;;  %v2711_v42 = vadd.f32 %v2710_v62, %v2709_v47  ;;  %v2149_v62 = vsel %vm2148_vm4, %v2070_v0, 0.0 }
 0x245   : > { %v2712_v40 = vpop.f32.mrf.mxu0  ;;  %v2791_v49 = vadd.f32 %v2790_v22, %v2789_v14  ;;  %v2168_v30 = vsel %vm2148_vm4, %v2095_v63, 0.0  ;;  %v2160_v22 = vadd.f32 %v2159_v53, %v2158_v9 }
 0x246   : > { %v2792_v23 = vpop.f32.mrf.mxu1 }
 0x247   : > { %v2713_v25 = vpop.f32.mrf.mxu0  ;;  %v2100_v41 = vadd.f32 %v2791_v49, %v2711_v42  ;;  %v2161_v1 = vrot.slane %v2160_v22, 4 }
 0x248   : > { %v2793_v45 = vpop.f32.mrf.mxu1  ;;  %v2714_v12 = vadd.f32 %v2713_v25, %v2712_v40  ;;  %v2167_v40 = vsel %vm2148_vm4, %v2090_v61, 0.0 }
 0x249   : > { %v2715_v16 = vpop.f32.mrf.mxu0  ;;  %v2794_v35 = vadd.f32 %v2793_v45, %v2792_v23  ;;  %v2169_v25 = vadd.f32 %v2168_v30, %v2167_v40  ;;  %v2176_v45 = vsel %vm2148_vm4, %v2100_v41, 0.0  ;;  %v2162_v11 = vadd.f32 %v2161_v1, %v2160_v22 }
 0x24a   : > { %v2795_v17 = vpop.f32.mrf.mxu1 }
 0x24b   : > { %v2716_v29 = vpop.f32.mrf.mxu0  ;;  %v2105_v54 = vadd.f32 %v2794_v35, %v2714_v12  ;;  %v2170_v28 = vrot.slane %v2169_v25, 4 }
 0x24c   : > { %v2796_v32 = vpop.f32.mrf.mxu1  ;;  %v2717_v57 = vadd.f32 %v2716_v29, %v2715_v16 }
 0x24d   : > { %v2718_v18 = vpop.f32.mrf.mxu0  ;;  %v2797_v50 = vadd.f32 %v2796_v32, %v2795_v17  ;;  %v2177_v33 = vsel %vm2148_vm4, %v2105_v54, 0.0  ;;  %v2151_v32 = vadd.f32 %v2150_v58, %v2149_v62  ;;  %v2171_v49 = vadd.f32 %v2170_v28, %v2169_v25 }
 0x24e   : > { %v2798_v34 = vpop.f32.mrf.mxu1 }
 0x24f   : > { %v2719_v5 = vpop.f32.mrf.mxu0  ;;  %v2110_v19 = vadd.f32 %v2797_v50, %v2717_v57  ;;  %v2152_v12 = vrot.slane %v2151_v32, 4  ;;  %v2172_v53 = vrot.slane %v2171_v49, 2 }
 0x250   : > { %v2799_v15 = vpop.f32.mrf.mxu1  ;;  %v2720_v51 = vadd.f32 %v2719_v5, %v2718_v18  ;;  %v2178_v18 = vadd.f32 %v2177_v33, %v2176_v45 }
 0x251   : > { %v2800_v52 = vadd.f32 %v2799_v15, %v2798_v34  ;;  %v2721_v4 = vpop.f32.mrf.mxu0  ;;  %v2185_v16 = vsel %vm2148_vm4, %v2110_v19, 0.0 }
 0x252   : > { %v2801_v48 = vpop.f32.mrf.mxu1  ;;  %v2179_v35 = vrot.slane %v2178_v18, 4 }
 0x253   : > { %v2722_v43 = vpop.f32.mrf.mxu0  ;;  %v2115_v46 = vadd.f32 %v2800_v52, %v2720_v51 }
 0x254   : > { %v2802_v37 = vpop.f32.mrf.mxu1  ;;  %v2723_v7 = vadd.f32 %v2722_v43, %v2721_v4  ;;  %v2153_v43 = vadd.f32 %v2152_v12, %v2151_v32  ;;  %v2180_v55 = vadd.f32 %v2179_v35, %v2178_v18 }
 0x255   : > { %v2803_v56 = vadd.f32 %v2802_v37, %v2801_v48  ;;  %v2724_v36 = vpop.f32.mrf.mxu0  ;;  %v2186_v2 = vsel %vm2148_vm4, %v2115_v46, 0.0 }
 0x256   : > { %v2804_v60 = vpop.f32.mrf.mxu1  ;;  %v2187_v20 = vadd.f32 %v2186_v2, %v2185_v16  ;;  %v2154_v19 = vrot.slane %v2153_v43, 2 }
 0x257   : > { %v2725_v31 = vpop.f32.mrf.mxu0  ;;  %v2120_v8 = vadd.f32 %v2803_v56, %v2723_v7 }
 0x258   : > { %v2726_v6 = vadd.f32 %v2725_v31, %v2724_v36  ;;  %v2805_v59 = vpop.f32.mrf.mxu1  ;;  %v2188_v51 = vrot.slane %v2187_v20, 4  ;;  %v2163_v36 = vrot.slane %v2162_v11, 2  ;;  %v2181_v31 = vrot.slane %v2180_v55, 2 }
 0x259   : > { %v2806_v47 = vadd.f32 %v2805_v59, %v2804_v60  ;;  %v2727_v14 = vpop.f32.mrf.mxu0  ;;  %v2194_v34 = vsel %vm2148_vm4, %v2120_v8, 0.0  ;;  %v2155_v22 = vadd.f32 %v2154_v19, %v2153_v43  ;;  %v2634_v43 = vld [vmem:[%s4339_s5] ss:$0 sm:$0xff] }
 0x25a   : > { %v2807_v23 = vpop.f32.mrf.mxu1  ;;  %v2189_v10 = vadd.f32 %v2188_v51, %v2187_v20  ;;  %v2164_v2 = vadd.f32 %v2163_v36, %v2162_v11  ;;  %v2182_v40 = vadd.f32 %v2181_v31, %v2180_v55  ;;  %v2868_v36 = vmov 1.0  }
 0x25b   : > { %v2125_v17 = vadd.f32 %v2806_v47, %v2726_v6  ;;  %v2728_v29 = vpop.f32.mrf.mxu0 }
 0x25c   : > { %v2808_v44 = vpop.f32.mrf.mxu1  ;;  %v2729_v38 = vadd.f32 %v2728_v29, %v2727_v14  ;;  %v2190_v6 = vrot.slane %v2189_v10, 2  ;;  %v2173_v14 = vadd.f32 %v2172_v53, %v2171_v49 }
 0x25d   : > { %v2195_v24 = vsel %vm2148_vm4, %v2125_v17, 0.0  ;;  %v2809_v39 = vadd.f32 %v2808_v44, %v2807_v23  ;;  %v2730_v5 = vpop.f32.mrf.mxu0  ;;  %v2165_v17 = vrot.slane %v2164_v2, 1  ;;  %v2156_v44 = vrot.slane %v2155_v22, 1 }
 0x25e   : > { %v2196_v3 = vadd.f32 %v2195_v24, %v2194_v34  ;;  %v2810_v26 = vpop.f32.mrf.mxu1  ;;  %v2191_v25 = vadd.f32 %v2190_v6, %v2189_v10  ;;  %v2174_v18 = vrot.slane %v2173_v14, 1  ;;  %v2183_v34 = vrot.slane %v2182_v40, 1 }
 0x25f   : > { %v2731_v15 = vpop.f32.mrf.mxu0  ;;  %v2130_v21 = vadd.f32 %v2809_v39, %v2729_v38  ;;  %v2166_v39 = vadd.f32 %v2165_v17, %v2164_v2  ;;  %v2157_v28 = vadd.f32 %v2156_v44, %v2155_v22 }
 0x260   : > { %v2732_v52 = vadd.f32 %v2731_v15, %v2730_v5  ;;  %v2811_v4 = vpop.f32.mrf.mxu1  ;;  %v2197_v48 = vrot.slane %v2196_v3, 4  ;;  %v2192_v38 = vrot.slane %v2191_v25, 1  ;;  %v2184_v15 = vadd.f32 %v2183_v34, %v2182_v40 }
 0x261   : > { %v2812_v13 = vadd.f32 %v2811_v4, %v2810_v26  ;;  %v2733_v27 = vpop.f32.mrf.mxu0  ;;  %v2203_v37 = vsel %vm2148_vm4, %v2130_v21, 0.0  ;;  %v2241_v51 = vsel %vm2240_vm5, %v2166_v39, %v2157_v28 }
 0x262   : > { %v2813_v42 = vpop.f32.mrf.mxu1  ;;  %v2198_v0 = vadd.f32 %v2197_v48, %v2196_v3  ;;  %v2175_v3 = vadd.f32 %v2174_v18, %v2173_v14  ;;  %v2193_v35 = vadd.f32 %v2192_v38, %v2191_v25 }
 0x263   : > { %v2135_v57 = vadd.f32 %v2812_v13, %v2732_v52  ;;  %v2734_v50 = vpop.f32.mrf.mxu0 }
 0x264   : > { %v2814_v63 = vpop.f32.mrf.mxu1  ;;  %v2735_v46 = vadd.f32 %v2734_v50, %v2733_v27  ;;  %v2199_v8 = vrot.slane %v2198_v0, 2  ;;  %v2243_v21 = vsel %vm2242_vm6, %v2175_v3, %v2241_v51 }
 0x265   : > { %v2204_v54 = vsel %vm2148_vm4, %v2135_v57, 0.0  ;;  %v2815_v7 = vadd.f32 %v2814_v63, %v2813_v42  ;;  %v2736_v56 = vpop.f32.mrf.mxu0  ;;  %v2245_v27 = vsel %vm2244_vm7, %v2184_v15, %v2243_v21 }
 0x266   : > { %v2205_v61 = vadd.f32 %v2204_v54, %v2203_v37  ;;  %v2816_v60 = vpop.f32.mrf.mxu1  ;;  %v2200_v29 = vadd.f32 %v2199_v8, %v2198_v0  ;;  %v2247_v48 = vsel %vm2246_vm8, %v2193_v35, %v2245_v27 }
 0x267   : > { %v2737_v41 = vpop.f32.mrf.mxu0  ;;  %v2140_v59 = vadd.f32 %v2815_v7, %v2735_v46 }
 0x268   : > { %v2206_v58 = vrot.slane %v2205_v61, 4  ;;  %v2738_v9 = vadd.f32 %v2737_v41, %v2736_v56  ;;  %v2817_v30 = vpop.f32.mrf.mxu1  ;;  %v2201_v5 = vrot.slane %v2200_v29, 1 }
 0x269   : > { %v2818_v33 = vadd.f32 %v2817_v30, %v2816_v60  ;;  %v2212_v45 = vsel %vm2148_vm4, %v2140_v59, 0.0 }
 0x26a   : > { %v2207_v47 = vadd.f32 %v2206_v58, %v2205_v61  ;;  %v2202_v52 = vadd.f32 %v2201_v5, %v2200_v29 }
 0x26b   : > { %v2145_v62 = vadd.f32 %v2818_v33, %v2738_v9 }
 0x26c   : > { %v2208_v23 = vrot.slane %v2207_v47, 2  ;;  %v2249_v42 = vsel %vm2248_vm9, %v2202_v52, %v2247_v48 }
 0x26d   : > { %v2213_v16 = vsel %vm2148_vm4, %v2145_v62, 0.0 }
 0x26e   : > { %v2214_v32 = vadd.f32 %v2213_v16, %v2212_v45  ;;  %v2209_v20 = vadd.f32 %v2208_v23, %v2207_v47 }
 0x270   : > { %v2215_v24 = vrot.slane %v2214_v32, 4  ;;  %v2210_v26 = vrot.slane %v2209_v20, 1 }
 0x272   : > { %v2216_v1 = vadd.f32 %v2215_v24, %v2214_v32  ;;  %v2211_v13 = vadd.f32 %v2210_v26, %v2209_v20 }
 0x274   : > { %v2217_v12 = vrot.slane %v2216_v1, 2  ;;  %v2251_v57 = vsel %vm2250_vm10, %v2211_v13, %v2249_v42 }
 0x276   : > { %v2218_v4 = vadd.f32 %v2217_v12, %v2216_v1 }
 0x278   : > { %v2219_v11 = vrot.slane %v2218_v4, 1 }
 0x27a   : > { %v2220_v49 = vadd.f32 %v2219_v11, %v2218_v4 }
 0x27c   : > { %v2253_v50 = vsel %vm2252_vm11, %v2220_v49, %v2251_v57 }
 0x27d   : > { %2835 = vmatmul.mubr.msk.f32.vlgmr.msra.gmra.mxu0 %vm2148_vm4, %v2253_v50 }
 0x33d   : > { %v2322_v55 = vpop.f32.mrf.mxu0 }
 0x33e   : > { %v2323_v10 = vadd.f32 %v2634_v43, %v2322_v55 }
 0x33f   : > { %v2836_v63 = vpop.f32.mrf.mxu0 }
 0x340   : > { %v2327_v37 = vsel %vm2326_vm12, %v2323_v10, -inf }
 0x341   : > { %2328 = vmax.xlane.f32.xlu0 %v2327_v37 }
 0x3ca   : > { %v2329_v54 = vpop.xlane.xlu0 %2328 }
 0x3cb   : > { %v2330_v46 = vsub.f32 %v2323_v10, %v2329_v54 }
 0x3cd   : > { %v2331_v7 = vmul.f32 1.442695, %v2330_v46 }
 0x3cf   : > { %2854 = vpow2.f32 %v2331_v7 }
 0x3dc   : > { %v2855_v56 = vpop.eup %2854 }
 0x3dd   : > { %2838 = vmatpush3.xpose.msk.msra.mxu1 %vm2326_vm12, %v2855_v56 }
 0x3e0   : > { %2840 = vmatmul.mubr.msk.f32.vlgmr.msra.gmra.mxu1 %vm2326_vm12, %v2868_v36 }
 0x4a0   : > { %v2405_v0 = vpop.f32.mrf.mxu1 }
 0x4a1   : > { %2856 = vrcp.f32 %v2405_v0 }
 0x4a2   : > { %v2841_v61 = vpop.f32.mrf.mxu1 }
 0x4ae   : > { %v2857_v60 = vpop.eup %2856 }
 0x4af   : > { %2411 = vst.msk [vmem:[%s252_s11] sm:$0x1] %vm2410_vm13, %v2857_v60 }
 0x4b0 PF: > { %s16_s21 = sadd.s32 1, %s2864_s21  }
 0x4b1   : > { %p13_p5 = scmp.ge.s32.totalorder %s16_s21, 4  }
 0x4b3   :  { %15 = sbr.rel (!%p13_p5) target bundleno = 1 (0x1), region = 76 }

</bundles_post_ra>
